<compile_context>
chip_gen: v7x
topology: tpu7x:2x2x1
jax: 0.10.0
libtpu: 0.0.40
codegen_flags: <defaults>
</compile_context>

<pallas_src>
import functools

import jax
import jax.numpy as jnp
from jax.experimental import pallas as pl
from jax.experimental.pallas import tpu as pltpu

# Squeeze sentinel for the size-1 batch block dim (None fallback for older jax).
_SQ = pl.Squeezed() if hasattr(pl, "Squeezed") else None


def _res_linear_attn_kernel(x_ref, wqkv_ref, wout_ref, bout_ref, g_ref, o_ref,
                            *, heads, dim_head, eps):
    # x_ref:    (c, n)                 one batch element, channels-first
    # wqkv_ref: (3*hidden, c)          to_qkv 1x1 conv weight (torch layout)
    # wout_ref: (heads, c, dim_head)   to_out 1x1 conv weight, pre-split per head
    # bout_ref: (c, 1)                 to_out 1x1 conv bias
    # g_ref:    (c, 1)                 channel LayerNorm gain
    # o_ref:    (c, n)
    c, n = x_ref.shape
    hidden = heads * dim_head
    scale = dim_head ** -0.5
    ctx_scale = scale / float(n)      # folds q*scale and v/(h*w) into the 32x32 context

    xb = x_ref[...]                                                     # (c, n)
    qkv = jnp.dot(wqkv_ref[...], xb,
                  preferred_element_type=jnp.float32)                   # (3*hidden, n)

    y = jnp.zeros((c, n), jnp.float32)
    for h in range(heads):                                              # static unroll
        lo = h * dim_head
        qh = qkv[lo:lo + dim_head, :]                                   # (d, n)
        kh = qkv[hidden + lo:hidden + lo + dim_head, :]                 # (d, n)
        vh = qkv[2 * hidden + lo:2 * hidden + lo + dim_head, :]         # (d, n)

        # torch q.softmax(dim=-2): softmax over dim_head == sublane axis here.
        qh = qh - jnp.max(qh, axis=0, keepdims=True)
        qe = jnp.exp(qh)
        qs = qe * pl.reciprocal(jnp.sum(qe, axis=0, keepdims=True), approx=True)

        # torch k.softmax(dim=-1): softmax over the n positions == lane axis.
        kh = kh - jnp.max(kh, axis=-1, keepdims=True)
        ke = jnp.exp(kh)
        ks = ke * pl.reciprocal(jnp.sum(ke, axis=-1, keepdims=True), approx=True)

        # ct[e, d] = sum_n v[e, n] * k[d, n]  (== context^T); scale once, tiny tile.
        ct = jnp.einsum('en,dn->ed', vh, ks,
                        preferred_element_type=jnp.float32) * ctx_scale  # (d, d)

        # Fold this head's to_out weight slice:  y += W_h @ ct @ q   (no concat).
        wc = jnp.dot(wout_ref[h], ct,
                     preferred_element_type=jnp.float32)                # (c, d)
        y = y + jnp.dot(wc, qs, preferred_element_type=jnp.float32)     # (c, n)

    # to_out bias + channel LayerNorm (over c, unbiased=False) + residual skip.
    y = y + bout_ref[...]
    mean = jnp.mean(y, axis=0, keepdims=True)
    var = jnp.mean((y - mean) ** 2, axis=0, keepdims=True)
    y = (y - mean) * jax.lax.rsqrt(var + eps) * g_ref[...]
    o_ref[...] = (y + xb.astype(jnp.float32)).astype(o_ref.dtype)


def residual_linear_attention(x_nchw, w_qkv, w_out, b_out, g, *, heads, dim_head):
    """Residual(LinearAttention) forward.

    x_nchw: (b, dim, h, w).  w_qkv: (3*hidden, dim) torch conv weight.
    w_out: (dim, hidden) torch conv weight.  b_out, g: (dim,).
    Returns (b, dim, h, w).
    """
    b, c, h, w = x_nchw.shape
    n = h * w
    hidden = heads * dim_head
    eps = 1e-5                         # matches torch LayerNorm default (all dtypes)

    # Channels-first flatten: no transpose passes needed (NCHW -> (b, c, n)).
    x_flat = x_nchw.reshape(b, c, n)
    # Split to_out weight per head once on the host (avoids in-kernel lane slicing).
    w_out_h = jnp.transpose(w_out.reshape(c, heads, dim_head), (1, 0, 2))
    b_out2 = b_out.reshape(c, 1)
    g2 = g.reshape(c, 1)

    kernel = functools.partial(_res_linear_attn_kernel,
                               heads=heads, dim_head=dim_head, eps=eps)

    out_flat = pl.pallas_call(
        kernel,
        out_shape=jax.ShapeDtypeStruct((b, c, n), x_nchw.dtype),
        grid_spec=pltpu.PrefetchScalarGridSpec(
            num_scalar_prefetch=0,
            grid=(b,),   # batch axis shards across TensorCores on v7x
            in_specs=[
                pl.BlockSpec((_SQ, c, n), lambda i: (i, 0, 0)),
                pl.BlockSpec((3 * hidden, c), lambda i: (0, 0)),
                pl.BlockSpec((heads, c, dim_head), lambda i: (0, 0, 0)),
                pl.BlockSpec((c, 1), lambda i: (0, 0)),
                pl.BlockSpec((c, 1), lambda i: (0, 0)),
            ],
            out_specs=pl.BlockSpec((_SQ, c, n), lambda i: (i, 0, 0)),
        ),
        compiler_params=pltpu.CompilerParams(
            dimension_semantics=("parallel",)),
    )(x_flat, w_qkv, w_out_h, b_out2, g2)

    # TODO(synk): at real diffusion resolutions (n >> 256) tile n via a second
    # grid axis so the per-step working set stays under v7x's 64 MiB VMEM.
    return out_flat.reshape(b, c, h, w)


def residual_linear_attention_ref(x_nchw, w_qkv, w_out, b_out, g, *, heads, dim_head):
    """Pure-JAX reference mirroring Residual(LinearAttention) in PyTorch."""
    b, c, h, w = x_nchw.shape
    n = h * w
    scale = dim_head ** -0.5
    eps = 1e-5

    x_flat = x_nchw.reshape(b, c, n)                                    # (b, c, n)
    qkv = jnp.einsum('oc,bcn->bon', w_qkv, x_flat)                      # (b, 3*hidden, n)
    q, k, v = jnp.split(qkv, 3, axis=1)

    def split_heads(t):  # (b, hidden, n) -> (b, heads, d, n)
        return t.reshape(b, heads, dim_head, n)

    q, k, v = map(split_heads, (q, k, v))
    q = jax.nn.softmax(q, axis=-2) * scale
    k = jax.nn.softmax(k, axis=-1)
    v = v / n
    context = jnp.einsum('bhdn,bhen->bhde', k, v)
    out = jnp.einsum('bhde,bhdn->bhen', context, q)                     # (b, heads, d, n)
    out = out.reshape(b, heads * dim_head, n)
    y = jnp.einsum('oj,bjn->bon', w_out, out) + b_out[None, :, None]
    mean = jnp.mean(y, axis=1, keepdims=True)
    var = jnp.mean((y - mean) ** 2, axis=1, keepdims=True)
    y = (y - mean) * jax.lax.rsqrt(var + eps) * g[None, :, None]
    return (y + x_flat).reshape(b, c, h, w)                             # residual skip


if __name__ == "__main__":
    dim, heads, dim_head = 4, 4, 32
    hidden = heads * dim_head
    b, h, w = 2, 16, 16

    key = jax.random.PRNGKey(0)
    k1, k2, k3, k4, k5 = jax.random.split(key, 5)

    x = jax.random.normal(k1, (b, dim, h, w), dtype=jnp.float32)
    # to_qkv: Conv2d(dim, 3*hidden, 1, bias=False) -> weight (3*hidden, dim)
    w_qkv = jax.random.normal(k2, (3 * hidden, dim), dtype=jnp.float32) * 0.2
    # to_out conv: Conv2d(hidden, dim, 1) -> weight (dim, hidden)
    w_out = jax.random.normal(k3, (dim, hidden), dtype=jnp.float32) * 0.1
    b_out = jax.random.normal(k4, (dim,), dtype=jnp.float32) * 0.1
    # LayerNorm gain g (ones-init in the module); perturb deterministically
    g = 1.0 + 0.1 * jax.random.normal(k5, (dim,), dtype=jnp.float32)

    out = residual_linear_attention(x, w_qkv, w_out, b_out, g,
                                    heads=heads, dim_head=dim_head)
    jax.block_until_ready(out)

    ref = residual_linear_attention_ref(x, w_qkv, w_out, b_out, g,
                                        heads=heads, dim_head=dim_head)
    assert out.shape == (b, dim, h, w)
    assert jnp.allclose(out, ref, atol=1e-2, rtol=1e-2), "mismatch vs reference"

    print("KERNEL_OK")
</pallas_src>

<mosaic_0001>
module attributes {stable_mosaic.version = 11 : i64} {
  func.func @_res_linear_attn_kernel(%arg0: i32, %arg1: memref<1x4x256xf32, #tpu.memory_space<vmem>>, %arg2: memref<384x4xf32, #tpu.memory_space<vmem>>, %arg3: memref<4x4x32xf32, #tpu.memory_space<vmem>>, %arg4: memref<4x1xf32, #tpu.memory_space<vmem>>, %arg5: memref<4x1xf32, #tpu.memory_space<vmem>>, %arg6: memref<1x4x256xf32, #tpu.memory_space<vmem>>) attributes {dimension_semantics = [#tpu.dimension_semantics<parallel>], iteration_bounds = array<i64: 2>, scalar_prefetch = 0 : i64, scratch_operands = 0 : i64, tpu.core_type = #tpu.core_type<tc>, window_params = [{transform_indices = @transform_0, window_bounds = array<i64: 1, 4, 256>}, {pipeline_mode = #tpu.pipeline_mode<synchronous>, transform_indices = @transform_1, window_bounds = array<i64: 384, 4>}, {pipeline_mode = #tpu.pipeline_mode<synchronous>, transform_indices = @transform_2, window_bounds = array<i64: 4, 4, 32>}, {pipeline_mode = #tpu.pipeline_mode<synchronous>, transform_indices = @transform_3, window_bounds = array<i64: 4, 1>}, {pipeline_mode = #tpu.pipeline_mode<synchronous>, transform_indices = @transform_4, window_bounds = array<i64: 4, 1>}, {transform_indices = @transform_5, window_bounds = array<i64: 1, 4, 256>}]} {
    %c0 = arith.constant 0 : index
    %c0_0 = arith.constant 0 : index
    %c0_1 = arith.constant 0 : index
    %0 = vector.load %arg1[%c0, %c0_0, %c0_1] : memref<1x4x256xf32, #tpu.memory_space<vmem>>, vector<1x4x256xf32>
    %1 = vector.shape_cast %0 : vector<1x4x256xf32> to vector<4x256xf32>
    %c0_2 = arith.constant 0 : index
    %c0_3 = arith.constant 0 : index
    %2 = vector.load %arg2[%c0_2, %c0_3] : memref<384x4xf32, #tpu.memory_space<vmem>>, vector<384x4xf32>
    %cst = arith.constant dense<0.000000e+00> : vector<384x256xf32>
    %3 = tpu.matmul %2, %1, %cst {dimension_numbers = #tpu.dot_dimension_numbers<[1], [0], [0], [1], [0, 0, 1, 1], [], []>} : vector<384x4xf32>, vector<4x256xf32>, vector<384x256xf32> -> vector<384x256xf32>
    %cst_4 = arith.constant 0.000000e+00 : f32
    %4 = vector.broadcast %cst_4 : f32 to vector<4x256xf32>
    %5 = vector.extract_strided_slice %3 {offsets = [0, 0], sizes = [32, 256], strides = [1, 1]} : vector<384x256xf32> to vector<32x256xf32>
    %6 = vector.extract_strided_slice %3 {offsets = [128, 0], sizes = [32, 256], strides = [1, 1]} : vector<384x256xf32> to vector<32x256xf32>
    %7 = vector.extract_strided_slice %3 {offsets = [256, 0], sizes = [32, 256], strides = [1, 1]} : vector<384x256xf32> to vector<32x256xf32>
    %cst_5 = arith.constant dense<0xFF800000> : vector<256xf32>
    %8 = vector.multi_reduction <maximumf>, %5, %cst_5 [0] : vector<32x256xf32> to vector<256xf32>
    %9 = vector.shape_cast %8 : vector<256xf32> to vector<1x256xf32>
    %10 = vector.broadcast %9 : vector<1x256xf32> to vector<32x256xf32>
    %11 = arith.subf %5, %10 : vector<32x256xf32>
    %12 = math.exp %11 : vector<32x256xf32>
    %cst_6 = arith.constant dense<0.000000e+00> : vector<256xf32>
    %13 = vector.multi_reduction <add>, %12, %cst_6 [0] : vector<32x256xf32> to vector<256xf32>
    %14 = vector.shape_cast %13 : vector<256xf32> to vector<1x256xf32>
    %15 = tpu.reciprocal %14 {approx = true} : vector<1x256xf32> -> vector<1x256xf32>
    %16 = vector.broadcast %15 : vector<1x256xf32> to vector<32x256xf32>
    %17 = arith.mulf %12, %16 : vector<32x256xf32>
    %cst_7 = arith.constant dense<0xFF800000> : vector<32xf32>
    %18 = vector.multi_reduction <maximumf>, %6, %cst_7 [1] : vector<32x256xf32> to vector<32xf32>
    %19 = vector.shape_cast %18 : vector<32xf32> to vector<32x1xf32>
    %20 = vector.broadcast %19 : vector<32x1xf32> to vector<32x256xf32>
    %21 = arith.subf %6, %20 : vector<32x256xf32>
    %22 = math.exp %21 : vector<32x256xf32>
    %cst_8 = arith.constant dense<0.000000e+00> : vector<32xf32>
    %23 = vector.multi_reduction <add>, %22, %cst_8 [1] : vector<32x256xf32> to vector<32xf32>
    %24 = vector.shape_cast %23 : vector<32xf32> to vector<32x1xf32>
    %25 = tpu.reciprocal %24 {approx = true} : vector<32x1xf32> -> vector<32x1xf32>
    %26 = vector.broadcast %25 : vector<32x1xf32> to vector<32x256xf32>
    %27 = arith.mulf %22, %26 : vector<32x256xf32>
    "tpu.trace_start"() <{level = 10 : i32, message = "en,dn->ed"}> : () -> ()
    %cst_9 = arith.constant dense<0.000000e+00> : vector<32x32xf32>
    %28 = tpu.matmul %7, %27, %cst_9 {dimension_numbers = #tpu.dot_dimension_numbers<[1], [1], [0], [0], [0, 0, 1, 0], [], []>} : vector<32x256xf32>, vector<32x256xf32>, vector<32x32xf32> -> vector<32x32xf32>
    "tpu.trace_stop"() : () -> ()
    %cst_10 = arith.constant 6.90533954E-4 : f32
    %29 = vector.broadcast %cst_10 : f32 to vector<32x32xf32>
    %30 = arith.mulf %28, %29 : vector<32x32xf32>
    %c0_11 = arith.constant 0 : index
    %c0_12 = arith.constant 0 : index
    %c0_13 = arith.constant 0 : index
    %31 = vector.load %arg3[%c0_11, %c0_12, %c0_13] : memref<4x4x32xf32, #tpu.memory_space<vmem>>, vector<1x4x32xf32>
    %32 = vector.shape_cast %31 : vector<1x4x32xf32> to vector<4x32xf32>
    %cst_14 = arith.constant dense<0.000000e+00> : vector<4x32xf32>
    %33 = tpu.matmul %32, %30, %cst_14 {dimension_numbers = #tpu.dot_dimension_numbers<[1], [0], [0], [1], [0, 0, 1, 1], [], []>} : vector<4x32xf32>, vector<32x32xf32>, vector<4x32xf32> -> vector<4x32xf32>
    %cst_15 = arith.constant dense<0.000000e+00> : vector<4x256xf32>
    %34 = tpu.matmul %33, %17, %cst_15 {dimension_numbers = #tpu.dot_dimension_numbers<[1], [0], [0], [1], [0, 0, 1, 1], [], []>} : vector<4x32xf32>, vector<32x256xf32>, vector<4x256xf32> -> vector<4x256xf32>
    %35 = arith.addf %4, %34 : vector<4x256xf32>
    %36 = vector.extract_strided_slice %3 {offsets = [32, 0], sizes = [32, 256], strides = [1, 1]} : vector<384x256xf32> to vector<32x256xf32>
    %37 = vector.extract_strided_slice %3 {offsets = [160, 0], sizes = [32, 256], strides = [1, 1]} : vector<384x256xf32> to vector<32x256xf32>
    %38 = vector.extract_strided_slice %3 {offsets = [288, 0], sizes = [32, 256], strides = [1, 1]} : vector<384x256xf32> to vector<32x256xf32>
    %cst_16 = arith.constant dense<0xFF800000> : vector<256xf32>
    %39 = vector.multi_reduction <maximumf>, %36, %cst_16 [0] : vector<32x256xf32> to vector<256xf32>
    %40 = vector.shape_cast %39 : vector<256xf32> to vector<1x256xf32>
    %41 = vector.broadcast %40 : vector<1x256xf32> to vector<32x256xf32>
    %42 = arith.subf %36, %41 : vector<32x256xf32>
    %43 = math.exp %42 : vector<32x256xf32>
    %cst_17 = arith.constant dense<0.000000e+00> : vector<256xf32>
    %44 = vector.multi_reduction <add>, %43, %cst_17 [0] : vector<32x256xf32> to vector<256xf32>
    %45 = vector.shape_cast %44 : vector<256xf32> to vector<1x256xf32>
    %46 = tpu.reciprocal %45 {approx = true} : vector<1x256xf32> -> vector<1x256xf32>
    %47 = vector.broadcast %46 : vector<1x256xf32> to vector<32x256xf32>
    %48 = arith.mulf %43, %47 : vector<32x256xf32>
    %cst_18 = arith.constant dense<0xFF800000> : vector<32xf32>
    %49 = vector.multi_reduction <maximumf>, %37, %cst_18 [1] : vector<32x256xf32> to vector<32xf32>
    %50 = vector.shape_cast %49 : vector<32xf32> to vector<32x1xf32>
    %51 = vector.broadcast %50 : vector<32x1xf32> to vector<32x256xf32>
    %52 = arith.subf %37, %51 : vector<32x256xf32>
    %53 = math.exp %52 : vector<32x256xf32>
    %cst_19 = arith.constant dense<0.000000e+00> : vector<32xf32>
    %54 = vector.multi_reduction <add>, %53, %cst_19 [1] : vector<32x256xf32> to vector<32xf32>
    %55 = vector.shape_cast %54 : vector<32xf32> to vector<32x1xf32>
    %56 = tpu.reciprocal %55 {approx = true} : vector<32x1xf32> -> vector<32x1xf32>
    %57 = vector.broadcast %56 : vector<32x1xf32> to vector<32x256xf32>
    %58 = arith.mulf %53, %57 : vector<32x256xf32>
    "tpu.trace_start"() <{level = 10 : i32, message = "en,dn->ed"}> : () -> ()
    %cst_20 = arith.constant dense<0.000000e+00> : vector<32x32xf32>
    %59 = tpu.matmul %38, %58, %cst_20 {dimension_numbers = #tpu.dot_dimension_numbers<[1], [1], [0], [0], [0, 0, 1, 0], [], []>} : vector<32x256xf32>, vector<32x256xf32>, vector<32x32xf32> -> vector<32x32xf32>
    "tpu.trace_stop"() : () -> ()
    %cst_21 = arith.constant 6.90533954E-4 : f32
    %60 = vector.broadcast %cst_21 : f32 to vector<32x32xf32>
    %61 = arith.mulf %59, %60 : vector<32x32xf32>
    %c1 = arith.constant 1 : index
    %c0_22 = arith.constant 0 : index
    %c0_23 = arith.constant 0 : index
    %62 = vector.load %arg3[%c1, %c0_22, %c0_23] : memref<4x4x32xf32, #tpu.memory_space<vmem>>, vector<1x4x32xf32>
    %63 = vector.shape_cast %62 : vector<1x4x32xf32> to vector<4x32xf32>
    %cst_24 = arith.constant dense<0.000000e+00> : vector<4x32xf32>
    %64 = tpu.matmul %63, %61, %cst_24 {dimension_numbers = #tpu.dot_dimension_numbers<[1], [0], [0], [1], [0, 0, 1, 1], [], []>} : vector<4x32xf32>, vector<32x32xf32>, vector<4x32xf32> -> vector<4x32xf32>
    %cst_25 = arith.constant dense<0.000000e+00> : vector<4x256xf32>
    %65 = tpu.matmul %64, %48, %cst_25 {dimension_numbers = #tpu.dot_dimension_numbers<[1], [0], [0], [1], [0, 0, 1, 1], [], []>} : vector<4x32xf32>, vector<32x256xf32>, vector<4x256xf32> -> vector<4x256xf32>
    %66 = arith.addf %35, %65 : vector<4x256xf32>
    %67 = vector.extract_strided_slice %3 {offsets = [64, 0], sizes = [32, 256], strides = [1, 1]} : vector<384x256xf32> to vector<32x256xf32>
    %68 = vector.extract_strided_slice %3 {offsets = [192, 0], sizes = [32, 256], strides = [1, 1]} : vector<384x256xf32> to vector<32x256xf32>
    %69 = vector.extract_strided_slice %3 {offsets = [320, 0], sizes = [32, 256], strides = [1, 1]} : vector<384x256xf32> to vector<32x256xf32>
    %cst_26 = arith.constant dense<0xFF800000> : vector<256xf32>
    %70 = vector.multi_reduction <maximumf>, %67, %cst_26 [0] : vector<32x256xf32> to vector<256xf32>
    %71 = vector.shape_cast %70 : vector<256xf32> to vector<1x256xf32>
    %72 = vector.broadcast %71 : vector<1x256xf32> to vector<32x256xf32>
    %73 = arith.subf %67, %72 : vector<32x256xf32>
    %74 = math.exp %73 : vector<32x256xf32>
    %cst_27 = arith.constant dense<0.000000e+00> : vector<256xf32>
    %75 = vector.multi_reduction <add>, %74, %cst_27 [0] : vector<32x256xf32> to vector<256xf32>
    %76 = vector.shape_cast %75 : vector<256xf32> to vector<1x256xf32>
    %77 = tpu.reciprocal %76 {approx = true} : vector<1x256xf32> -> vector<1x256xf32>
    %78 = vector.broadcast %77 : vector<1x256xf32> to vector<32x256xf32>
    %79 = arith.mulf %74, %78 : vector<32x256xf32>
    %cst_28 = arith.constant dense<0xFF800000> : vector<32xf32>
    %80 = vector.multi_reduction <maximumf>, %68, %cst_28 [1] : vector<32x256xf32> to vector<32xf32>
    %81 = vector.shape_cast %80 : vector<32xf32> to vector<32x1xf32>
    %82 = vector.broadcast %81 : vector<32x1xf32> to vector<32x256xf32>
    %83 = arith.subf %68, %82 : vector<32x256xf32>
    %84 = math.exp %83 : vector<32x256xf32>
    %cst_29 = arith.constant dense<0.000000e+00> : vector<32xf32>
    %85 = vector.multi_reduction <add>, %84, %cst_29 [1] : vector<32x256xf32> to vector<32xf32>
    %86 = vector.shape_cast %85 : vector<32xf32> to vector<32x1xf32>
    %87 = tpu.reciprocal %86 {approx = true} : vector<32x1xf32> -> vector<32x1xf32>
    %88 = vector.broadcast %87 : vector<32x1xf32> to vector<32x256xf32>
    %89 = arith.mulf %84, %88 : vector<32x256xf32>
    "tpu.trace_start"() <{level = 10 : i32, message = "en,dn->ed"}> : () -> ()
    %cst_30 = arith.constant dense<0.000000e+00> : vector<32x32xf32>
    %90 = tpu.matmul %69, %89, %cst_30 {dimension_numbers = #tpu.dot_dimension_numbers<[1], [1], [0], [0], [0, 0, 1, 0], [], []>} : vector<32x256xf32>, vector<32x256xf32>, vector<32x32xf32> -> vector<32x32xf32>
    "tpu.trace_stop"() : () -> ()
    %cst_31 = arith.constant 6.90533954E-4 : f32
    %91 = vector.broadcast %cst_31 : f32 to vector<32x32xf32>
    %92 = arith.mulf %90, %91 : vector<32x32xf32>
    %c2 = arith.constant 2 : index
    %c0_32 = arith.constant 0 : index
    %c0_33 = arith.constant 0 : index
    %93 = vector.load %arg3[%c2, %c0_32, %c0_33] : memref<4x4x32xf32, #tpu.memory_space<vmem>>, vector<1x4x32xf32>
    %94 = vector.shape_cast %93 : vector<1x4x32xf32> to vector<4x32xf32>
    %cst_34 = arith.constant dense<0.000000e+00> : vector<4x32xf32>
    %95 = tpu.matmul %94, %92, %cst_34 {dimension_numbers = #tpu.dot_dimension_numbers<[1], [0], [0], [1], [0, 0, 1, 1], [], []>} : vector<4x32xf32>, vector<32x32xf32>, vector<4x32xf32> -> vector<4x32xf32>
    %cst_35 = arith.constant dense<0.000000e+00> : vector<4x256xf32>
    %96 = tpu.matmul %95, %79, %cst_35 {dimension_numbers = #tpu.dot_dimension_numbers<[1], [0], [0], [1], [0, 0, 1, 1], [], []>} : vector<4x32xf32>, vector<32x256xf32>, vector<4x256xf32> -> vector<4x256xf32>
    %97 = arith.addf %66, %96 : vector<4x256xf32>
    %98 = vector.extract_strided_slice %3 {offsets = [96, 0], sizes = [32, 256], strides = [1, 1]} : vector<384x256xf32> to vector<32x256xf32>
    %99 = vector.extract_strided_slice %3 {offsets = [224, 0], sizes = [32, 256], strides = [1, 1]} : vector<384x256xf32> to vector<32x256xf32>
    %100 = vector.extract_strided_slice %3 {offsets = [352, 0], sizes = [32, 256], strides = [1, 1]} : vector<384x256xf32> to vector<32x256xf32>
    %cst_36 = arith.constant dense<0xFF800000> : vector<256xf32>
    %101 = vector.multi_reduction <maximumf>, %98, %cst_36 [0] : vector<32x256xf32> to vector<256xf32>
    %102 = vector.shape_cast %101 : vector<256xf32> to vector<1x256xf32>
    %103 = vector.broadcast %102 : vector<1x256xf32> to vector<32x256xf32>
    %104 = arith.subf %98, %103 : vector<32x256xf32>
    %105 = math.exp %104 : vector<32x256xf32>
    %cst_37 = arith.constant dense<0.000000e+00> : vector<256xf32>
    %106 = vector.multi_reduction <add>, %105, %cst_37 [0] : vector<32x256xf32> to vector<256xf32>
    %107 = vector.shape_cast %106 : vector<256xf32> to vector<1x256xf32>
    %108 = tpu.reciprocal %107 {approx = true} : vector<1x256xf32> -> vector<1x256xf32>
    %109 = vector.broadcast %108 : vector<1x256xf32> to vector<32x256xf32>
    %110 = arith.mulf %105, %109 : vector<32x256xf32>
    %cst_38 = arith.constant dense<0xFF800000> : vector<32xf32>
    %111 = vector.multi_reduction <maximumf>, %99, %cst_38 [1] : vector<32x256xf32> to vector<32xf32>
    %112 = vector.shape_cast %111 : vector<32xf32> to vector<32x1xf32>
    %113 = vector.broadcast %112 : vector<32x1xf32> to vector<32x256xf32>
    %114 = arith.subf %99, %113 : vector<32x256xf32>
    %115 = math.exp %114 : vector<32x256xf32>
    %cst_39 = arith.constant dense<0.000000e+00> : vector<32xf32>
    %116 = vector.multi_reduction <add>, %115, %cst_39 [1] : vector<32x256xf32> to vector<32xf32>
    %117 = vector.shape_cast %116 : vector<32xf32> to vector<32x1xf32>
    %118 = tpu.reciprocal %117 {approx = true} : vector<32x1xf32> -> vector<32x1xf32>
    %119 = vector.broadcast %118 : vector<32x1xf32> to vector<32x256xf32>
    %120 = arith.mulf %115, %119 : vector<32x256xf32>
    "tpu.trace_start"() <{level = 10 : i32, message = "en,dn->ed"}> : () -> ()
    %cst_40 = arith.constant dense<0.000000e+00> : vector<32x32xf32>
    %121 = tpu.matmul %100, %120, %cst_40 {dimension_numbers = #tpu.dot_dimension_numbers<[1], [1], [0], [0], [0, 0, 1, 0], [], []>} : vector<32x256xf32>, vector<32x256xf32>, vector<32x32xf32> -> vector<32x32xf32>
    "tpu.trace_stop"() : () -> ()
    %cst_41 = arith.constant 6.90533954E-4 : f32
    %122 = vector.broadcast %cst_41 : f32 to vector<32x32xf32>
    %123 = arith.mulf %121, %122 : vector<32x32xf32>
    %c3 = arith.constant 3 : index
    %c0_42 = arith.constant 0 : index
    %c0_43 = arith.constant 0 : index
    %124 = vector.load %arg3[%c3, %c0_42, %c0_43] : memref<4x4x32xf32, #tpu.memory_space<vmem>>, vector<1x4x32xf32>
    %125 = vector.shape_cast %124 : vector<1x4x32xf32> to vector<4x32xf32>
    %cst_44 = arith.constant dense<0.000000e+00> : vector<4x32xf32>
    %126 = tpu.matmul %125, %123, %cst_44 {dimension_numbers = #tpu.dot_dimension_numbers<[1], [0], [0], [1], [0, 0, 1, 1], [], []>} : vector<4x32xf32>, vector<32x32xf32>, vector<4x32xf32> -> vector<4x32xf32>
    %cst_45 = arith.constant dense<0.000000e+00> : vector<4x256xf32>
    %127 = tpu.matmul %126, %110, %cst_45 {dimension_numbers = #tpu.dot_dimension_numbers<[1], [0], [0], [1], [0, 0, 1, 1], [], []>} : vector<4x32xf32>, vector<32x256xf32>, vector<4x256xf32> -> vector<4x256xf32>
    %128 = arith.addf %97, %127 : vector<4x256xf32>
    %c0_46 = arith.constant 0 : index
    %c0_47 = arith.constant 0 : index
    %129 = vector.load %arg4[%c0_46, %c0_47] : memref<4x1xf32, #tpu.memory_space<vmem>>, vector<4x1xf32>
    %130 = vector.broadcast %129 : vector<4x1xf32> to vector<4x256xf32>
    %131 = arith.addf %128, %130 : vector<4x256xf32>
    %cst_48 = arith.constant dense<0.000000e+00> : vector<256xf32>
    %132 = vector.multi_reduction <add>, %131, %cst_48 [0] : vector<4x256xf32> to vector<256xf32>
    %133 = vector.shape_cast %132 : vector<256xf32> to vector<1x256xf32>
    %cst_49 = arith.constant 4.000000e+00 : f32
    %134 = vector.broadcast %cst_49 : f32 to vector<1x256xf32>
    %135 = arith.divf %133, %134 : vector<1x256xf32>
    %136 = vector.broadcast %135 : vector<1x256xf32> to vector<4x256xf32>
    %137 = arith.subf %131, %136 : vector<4x256xf32>
    %138 = arith.mulf %137, %137 : vector<4x256xf32>
    %cst_50 = arith.constant dense<0.000000e+00> : vector<256xf32>
    %139 = vector.multi_reduction <add>, %138, %cst_50 [0] : vector<4x256xf32> to vector<256xf32>
    %140 = vector.shape_cast %139 : vector<256xf32> to vector<1x256xf32>
    %cst_51 = arith.constant 4.000000e+00 : f32
    %141 = vector.broadcast %cst_51 : f32 to vector<1x256xf32>
    %142 = arith.divf %140, %141 : vector<1x256xf32>
    %143 = vector.broadcast %135 : vector<1x256xf32> to vector<4x256xf32>
    %144 = arith.subf %131, %143 : vector<4x256xf32>
    %cst_52 = arith.constant 9.99999974E-6 : f32
    %145 = vector.broadcast %cst_52 : f32 to vector<1x256xf32>
    %146 = arith.addf %142, %145 : vector<1x256xf32>
    %147 = math.rsqrt %146 : vector<1x256xf32>
    %148 = vector.broadcast %147 : vector<1x256xf32> to vector<4x256xf32>
    %149 = arith.mulf %144, %148 : vector<4x256xf32>
    %c0_53 = arith.constant 0 : index
    %c0_54 = arith.constant 0 : index
    %150 = vector.load %arg5[%c0_53, %c0_54] : memref<4x1xf32, #tpu.memory_space<vmem>>, vector<4x1xf32>
    %151 = vector.broadcast %150 : vector<4x1xf32> to vector<4x256xf32>
    %152 = arith.mulf %149, %151 : vector<4x256xf32>
    %153 = arith.addf %152, %1 : vector<4x256xf32>
    %c0_55 = arith.constant 0 : index
    %c0_56 = arith.constant 0 : index
    %c0_57 = arith.constant 0 : index
    %154 = vector.load %arg6[%c0_55, %c0_56, %c0_57] : memref<1x4x256xf32, #tpu.memory_space<vmem>>, vector<1x4x256xf32>
    %155 = vector.shape_cast %154 : vector<1x4x256xf32> to vector<4x256xf32>
    %156 = vector.shape_cast %153 : vector<4x256xf32> to vector<1x4x256xf32>
    tpu.vector_store %arg6[%c0_55, %c0_56, %c0_57], %156 {strides = array<i32>} : memref<1x4x256xf32, #tpu.memory_space<vmem>>, vector<1x4x256xf32>,
    return
  }
  func.func @transform_0(%arg0: i32) -> (i32, i32, i32) {
    %c0_i32 = arith.constant 0 : i32
    %c0_i32_0 = arith.constant 0 : i32
    %c0_i32_1 = arith.constant 0 : i32
    return %arg0, %c0_i32, %c0_i32_0 : i32, i32, i32
  }
  func.func @transform_1(%arg0: i32) -> (i32, i32) {
    %c0_i32 = arith.constant 0 : i32
    %c0_i32_0 = arith.constant 0 : i32
    %c0_i32_1 = arith.constant 0 : i32
    return %c0_i32, %c0_i32_0 : i32, i32
  }
  func.func @transform_2(%arg0: i32) -> (i32, i32, i32) {
    %c0_i32 = arith.constant 0 : i32
    %c0_i32_0 = arith.constant 0 : i32
    %c0_i32_1 = arith.constant 0 : i32
    %c0_i32_2 = arith.constant 0 : i32
    return %c0_i32, %c0_i32_0, %c0_i32_1 : i32, i32, i32
  }
  func.func @transform_3(%arg0: i32) -> (i32, i32) {
    %c0_i32 = arith.constant 0 : i32
    %c0_i32_0 = arith.constant 0 : i32
    %c0_i32_1 = arith.constant 0 : i32
    return %c0_i32, %c0_i32_0 : i32, i32
  }
  func.func @transform_4(%arg0: i32) -> (i32, i32) {
    %c0_i32 = arith.constant 0 : i32
    %c0_i32_0 = arith.constant 0 : i32
    %c0_i32_1 = arith.constant 0 : i32
    return %c0_i32, %c0_i32_0 : i32, i32
  }
  func.func @transform_5(%arg0: i32) -> (i32, i32, i32) {
    %c0_i32 = arith.constant 0 : i32
    %c0_i32_0 = arith.constant 0 : i32
    %c0_i32_1 = arith.constant 0 : i32
    return %arg0, %c0_i32, %c0_i32_0 : i32, i32, i32
  }
}

</mosaic_0001>

<bundles_post_ra>
// kernel: tpu_custom_call.1
= control target key start
LH: loop header
LB: loop body
LE: loop exit
PB: predicated region body
PF: predicated region fallthrough
CT: control target
= control target key end

     0   :  { %10 = vsyncpa [#allocation3], 0  ;;  %s4142_s0 = inlined_call_operand.vmem [shape: f32[2,4,256], index: 0, kind: input, shape index: {}]   ;;  %s4143_s1 = inlined_call_operand.vmem [shape: f32[384,4], index: 1, kind: input, shape index: {}]   ;;  %s4144_s2 = inlined_call_operand.vmem [shape: f32[4,4,32], index: 2, kind: input, shape index: {}]   ;;  %s4145_s3 = inlined_call_operand.vmem [shape: f32[4,1], index: 3, kind: input, shape index: {}]   ;;  %s4146_s4 = inlined_call_operand.vmem [shape: f32[4,1], index: 4, kind: input, shape index: {}]   ;;  %s4147_s5 = inlined_call_operand.hbm [shape: f32[2,4,256], index: 5, kind: output, shape index: {}]  }
   0x1   :  { %12 = vsyncpa [#allocation3 + $0x1], 0  ;;  %s2955_s18 = smov 0   ;;  %s2957_s19 = smov 0  }
   0x2   :  { %s2959_s20 = smov 0   ;;  %s2961_s21 = smov 0  }
   0x3 LB: > { %s2976_s22 = sadd.s32 4294967295, %s2918_s21   ;;  %s2394_s23 = sadd.s32 4294967294, %s2918_s21   ;;  %s2918_s21 = sphi %s2961_s21, %s4263_s21   ;;  %s2914_s20 = sphi %s2959_s20, %s4262_s20   ;;  %s2910_s19 = sphi %s2957_s19, %s4261_s19   ;;  %s2906_s18 = sphi %s2955_s18, %s4260_s18  }
   0x4   : > { %s2980_s24 = sadd.s32 1, %s2918_s21   ;;  %s135_s25 = sadd.s32 1, %s2914_s20 }
   0x5   : > { %s132_s26 = ssub.s32 %s2918_s21, %s2980_s24  ;;  %p145_p0 = scmp.ne.s32.totalorder %s2914_s20, %s2910_s19 }
   0x6   : > { %p133_p1 = scmp.eq.s32.totalorder %s132_s26, 0  ;;  %p146_p2 = scmp.eq.s32.totalorder %s2976_s22, 1 }
   0x7   : > { %p151_p3 = scmp.ne.s32.totalorder %s2910_s19, %s2906_s18  ;;  %p152_p4 = scmp.eq.s32.totalorder %s2394_s23, 1 }
   0x8   : > { %s2991_s27 = scalar_select %p133_p1, %s2914_s20, %s135_s25  }
   0x9   : > { %p2993_p5 = por %p146_p2, %p145_p0  ;;  %p2997_p6 = por %p152_p4, %p151_p3 }
   0xa   : > { %p2397_p7 = scmp.ge.s32.totalorder %s2918_s21, 1  ;;  %p190_p8 = scmp.lt.s32.totalorder %s2918_s21, 3 }
   0xc   : > { %p191_p9 = pnand %p2397_p7, %p190_p8 }
   0xe   : > { %194 = sbr.rel (%p191_p9) target bundleno = 2564 (0xa04), region = 40 }
  0x15   : > { %p218_p10 = scmp.lt.s32.totalorder %s2976_s22, 1  ;;  %v4148_v0 = vmov 0.0   ;;  %vm419_vm0 = vcmask 1043456   ;;  %v224_v3 = vld [vmem:[%s4143_s1] sm:$0xff]  ;;  %vm274_vm1 = vcmask 31744   ;;  %v225_v4 = vld [vmem:[%s4143_s1 + $0x8] sm:$0xff] }
  0x16   : > { %488 = vmatprep.mubr.f32.mxu0 %v4148_v0  ;;  %746 = vmatprep.mubr.f32.mxu1 %v4148_v0  ;;  %v226_v5 = vld [vmem:[%s4143_s1 + $0x10] sm:$0xff]  ;;  %v227_v6 = vld [vmem:[%s4143_s1 + $0x18] sm:$0xff]  ;;  %v228_v7 = vld [vmem:[%s4143_s1 + $0x20] sm:$0xff]  ;;  %vm2922_vm2 = vmmov 0   ;;  %vm997_vm3 = vcmask 261120   ;;  %s215_s13 = sand.u32 1, %s2910_s19  }
  0x17   : > { %s219_s30 = scalar_select %p218_p10, %s2976_s22, 1  ;;  %v229_v8 = vld [vmem:[%s4143_s1 + $0x28] sm:$0xff]  ;;  %v230_v9 = vld [vmem:[%s4143_s1 + $0x30] sm:$0xff]  ;;  %v231_v10 = vld [vmem:[%s4143_s1 + $0x38] sm:$0xff] }
  0x18   : > { %v232_v11 = vld [vmem:[%s4143_s1 + $0x40] sm:$0xff]  ;;  %v233_v12 = vld [vmem:[%s4143_s1 + $0x48] sm:$0xff]  ;;  %v234_v13 = vld [vmem:[%s4143_s1 + $0x50] sm:$0xff]  ;;  %s2398_s14 = sshll.u32 %s215_s13, 3  ;;  %s2468_s15 = sshll.u32 %s2976_s22, 7 }
  0x19   : > { %s2467_s6 = sshll.u32 %s219_s30, 3  ;;  %v235_v14 = vld [vmem:[%s4143_s1 + $0x58] sm:$0xff]  ;;  %v236_v15 = vld [vmem:[%s4143_s1 + $0x60] sm:$0xff]  ;;  %v237_v16 = vld [vmem:[%s4143_s1 + $0x68] sm:$0xff]  ;;  %s217_s16 = scalar_lea.vmem [#allocation2], %s2398_s14 }
  0x1a   : > { %s3010_s9 = scalar_lea.vmem %s4142_s0, %s2467_s6  ;;  %v238_v17 = vld [vmem:[%s4143_s1 + $0x70] sm:$0xff]  ;;  %v239_v18 = vld [vmem:[%s4143_s1 + $0x78] sm:$0xff]  ;;  %v240_v19 = vld [vmem:[%s4143_s1 + $0x80] sm:$0xff]  ;;  %s2335_s17 = sshll.u32 %s217_s16, 4  ;;  %s4102_s17 = int_to_ptr.vmem [resolvable:$true] %s2335_s17 }
  0x1b   : > { %v223_v1 = vld [vmem:[%s3010_s9] sm:$0xff]  ;;  %v241_v20 = vld [vmem:[%s4143_s1 + $0x88] sm:$0xff]  ;;  %v242_v21 = vld [vmem:[%s4143_s1 + $0x90] sm:$0xff]  ;;  %s4100_s26 = scalar_lea.hbm %s4147_s5, %s2468_s15  ;;  %s2321_s30 = scalar_lea.sflag [#allocation3], %s215_s13 }
  0x1c   : > { %v3013_v2 = vcombine.high %v223_v1, %v223_v1  ;;  %v243_v22 = vld [vmem:[%s4143_s1 + $0x98] sm:$0xff]  ;;  %v244_v23 = vld [vmem:[%s4143_s1 + $0xa0] sm:$0xff]  ;;  %v245_v24 = vld [vmem:[%s4143_s1 + $0xa8] sm:$0xff]  ;;  %s2924_s22 = smov [#allocation2]  }
  0x1d   : > { %v246_v25 = vld [vmem:[%s4143_s1 + $0xb0] sm:$0xff]  ;;  %v247_v26 = vld [vmem:[%s4143_s1 + $0xb8] sm:$0xff]  ;;  %v248_v27 = vld [vmem:[%s4143_s1 + $0xc0] sm:$0xff]  ;;  %s2860_s6 = sshll.u32 %s2924_s22, 4  ;;  %s2861_s6 = int_to_ptr.vmem [resolvable:$false] %s2860_s6 }
  0x1e   : > { %4178 = vst [vmem:[#allocation5_spill] sm:$0xff] %v3013_v2  ;;  %2401 = vmatprep.subr.msk.mxu0 %vm419_vm0, %v3013_v2  ;;  %2621 = vmatprep.subr.msk.mxu1 %vm419_vm0, %v3013_v2  ;;  %v249_v28 = vld [vmem:[%s4143_s1 + $0xc8] sm:$0xff]  ;;  %v250_v30 = vld [vmem:[%s4143_s1 + $0xd0] sm:$0xff]  ;;  %v251_v33 = vld [vmem:[%s4143_s1 + $0xd8] sm:$0xff]  ;;  %s2862_s7 = scalar_lea.vmem %s2861_s6, 256  ;;  %p2863_p0 = scmp.lt.s32.totalorder %s4102_s17, %s2861_s6 }
  0x1f   : > { %2402 = vmatpush1.msk.msra.mxu0 %vm419_vm0, %v223_v1  ;;  %2622 = vmatpush1.msk.msra.mxu1 %vm419_vm0, %v223_v1  ;;  %v252_v36 = vld [vmem:[%s4143_s1 + $0xe0] sm:$0xff]  ;;  %v253_v41 = vld [vmem:[%s4143_s1 + $0xe8] sm:$0xff]  ;;  %v254_v48 = vld [vmem:[%s4143_s1 + $0xf0] sm:$0xff] }
  0x20   : > { %2403 = vmatmul.mubr.msk.f32.vlgmr.msra.gmra.mrb[0].mxu0 %vm274_vm1, %v224_v3  ;;  %v255_v55 = vld [vmem:[%s4143_s1 + $0xf8] sm:$0xff]  ;;  %v256_v62 = vld [vmem:[%s4143_s1 + $0x100] sm:$0xff] }
  0x21   : > { %494 = vmatprep.mubr.f32.mxu0 %v4148_v0 }
  0x24   : > { %2404 = vmatmul.mubr.msk.f32.gmra.mrb[2].mxu0 %vm274_vm1, %v225_v4 }
  0x25   : > { %500 = vmatprep.mubr.f32.mxu0 %v4148_v0 }
  0x28   : > { %2405 = vmatmul.mubr.msk.f32.gmra.mrb[4].mxu0 %vm274_vm1, %v226_v5 }
  0x29   : > { %506 = vmatprep.mubr.f32.mxu0 %v4148_v0 }
  0x2c   : > { %2406 = vmatmul.mubr.msk.f32.gmra.mrb[6].mxu0 %vm274_vm1, %v227_v6 }
  0x2d   : > { %512 = vmatprep.mubr.f32.mxu0 %v4148_v0 }
  0x30   : > { %2407 = vmatmul.mubr.msk.f32.gmra.mrb[8].mxu0 %vm274_vm1, %v228_v7 }
  0x31   : > { %518 = vmatprep.mubr.f32.mxu0 %v4148_v0 }
  0x34   : > { %2408 = vmatmul.mubr.msk.f32.gmra.mrb[10].mxu0 %vm274_vm1, %v229_v8 }
  0x35   : > { %524 = vmatprep.mubr.f32.mxu0 %v4148_v0 }
  0x38   : > { %2409 = vmatmul.mubr.msk.f32.gmra.mrb[12].mxu0 %vm274_vm1, %v230_v9  ;;  %v257_v9 = vld [vmem:[%s4143_s1 + $0x108] sm:$0xff] }
  0x39   : > { %530 = vmatprep.mubr.f32.mxu0 %v4148_v0 }
  0x3c   : > { %2410 = vmatmul.mubr.msk.f32.gmra.mrb[14].mxu0 %vm274_vm1, %v231_v10 }
  0x3d   : > { %536 = vmatprep.mubr.f32.mxu0 %v4148_v0 }
  0x40   : > { %2411 = vmatmul.mubr.msk.f32.gmra.mrb[16].mxu0 %vm274_vm1, %v232_v11 }
  0x41   : > { %542 = vmatprep.mubr.f32.mxu0 %v4148_v0 }
  0x44   : > { %2412 = vmatmul.mubr.msk.f32.gmra.mrb[18].mxu0 %vm274_vm1, %v233_v12 }
  0x45   : > { %548 = vmatprep.mubr.f32.mxu0 %v4148_v0 }
  0x48   : > { %2413 = vmatmul.mubr.msk.f32.gmra.mrb[20].mxu0 %vm274_vm1, %v234_v13 }
  0x49   : > { %554 = vmatprep.mubr.f32.mxu0 %v4148_v0 }
  0x4c   : > { %2414 = vmatmul.mubr.msk.f32.gmra.mrb[22].mxu0 %vm274_vm1, %v235_v14 }
  0x4d   : > { %560 = vmatprep.mubr.f32.mxu0 %v4148_v0 }
  0x50   : > { %2415 = vmatmul.mubr.msk.f32.gmra.mrb[24].mxu0 %vm274_vm1, %v236_v15 }
  0x51   : > { %566 = vmatprep.mubr.f32.mxu0 %v4148_v0 }
  0x54   : > { %2416 = vmatmul.mubr.msk.f32.gmra.mrb[26].mxu0 %vm274_vm1, %v237_v16 }
  0x55   : > { %572 = vmatprep.mubr.f32.mxu0 %v4148_v0 }
  0x58   : > { %2417 = vmatmul.mubr.msk.f32.gmra.mrb[28].mxu0 %vm274_vm1, %v238_v17 }
  0x59   : > { %578 = vmatprep.mubr.f32.mxu0 %v4148_v0 }
  0x5c   : > { %2418 = vmatmul.mubr.msk.f32.gmra.mrb[30].mxu0 %vm274_vm1, %v239_v18 }
  0x5d   : > { %584 = vmatprep.mubr.f32.mxu0 %v4148_v0 }
  0x60   : > { %2419 = vmatmul.mubr.msk.f32.gmra.mrb[32].mxu0 %vm274_vm1, %v240_v19 }
  0x61   : > { %590 = vmatprep.mubr.f32.mxu0 %v4148_v0 }
  0x64   : > { %2420 = vmatmul.mubr.msk.f32.gmra.mrb[34].mxu0 %vm274_vm1, %v241_v20 }
  0x65   : > { %596 = vmatprep.mubr.f32.mxu0 %v4148_v0 }
  0x68   : > { %2421 = vmatmul.mubr.msk.f32.gmra.mrb[36].mxu0 %vm274_vm1, %v242_v21 }
  0x69   : > { %602 = vmatprep.mubr.f32.mxu0 %v4148_v0 }
  0x6c   : > { %2422 = vmatmul.mubr.msk.f32.gmra.mrb[38].mxu0 %vm274_vm1, %v243_v22 }
  0x6d   : > { %608 = vmatprep.mubr.f32.mxu0 %v4148_v0 }
  0x70   : > { %2423 = vmatmul.mubr.msk.f32.gmra.mrb[40].mxu0 %vm274_vm1, %v244_v23 }
  0x71   : > { %614 = vmatprep.mubr.f32.mxu0 %v4148_v0 }
  0x74   : > { %2424 = vmatmul.mubr.msk.f32.gmra.mrb[42].mxu0 %vm274_vm1, %v245_v24 }
  0x75   : > { %620 = vmatprep.mubr.f32.mxu0 %v4148_v0 }
  0x78   : > { %2425 = vmatmul.mubr.msk.f32.gmra.mrb[44].mxu0 %vm274_vm1, %v246_v25  ;;  %v258_v25 = vld [vmem:[%s4143_s1 + $0x110] sm:$0xff] }
  0x79   : > { %626 = vmatprep.mubr.f32.mxu0 %v4148_v0 }
  0x7c   : > { %2426 = vmatmul.mubr.msk.f32.gmra.mrb[46].mxu0 %vm274_vm1, %v247_v26 }
  0x7d   : > { %632 = vmatprep.mubr.f32.mxu0 %v4148_v0 }
  0x80   : > { %2427 = vmatmul.mubr.msk.f32.gmra.mrb[48].mxu0 %vm274_vm1, %v248_v27 }
  0x81   : > { %638 = vmatprep.mubr.f32.mxu0 %v4148_v0 }
  0x84   : > { %2428 = vmatmul.mubr.msk.f32.gmra.mrb[50].mxu0 %vm274_vm1, %v249_v28 }
  0x85   : > { %644 = vmatprep.mubr.f32.mxu0 %v4148_v0 }
  0x88   : > { %2429 = vmatmul.mubr.msk.f32.gmra.mrb[52].mxu0 %vm274_vm1, %v250_v30 }
  0x89   : > { %650 = vmatprep.mubr.f32.mxu0 %v4148_v0 }
  0x8c   : > { %2430 = vmatmul.mubr.msk.f32.gmra.mrb[54].mxu0 %vm274_vm1, %v251_v33 }
  0x8d   : > { %656 = vmatprep.mubr.f32.mxu0 %v4148_v0 }
  0x90   : > { %2431 = vmatmul.mubr.msk.f32.gmra.mrb[56].mxu0 %vm274_vm1, %v252_v36  ;;  %v259_v36 = vld [vmem:[%s4143_s1 + $0x118] sm:$0xff] }
  0x91   : > { %662 = vmatprep.mubr.f32.mxu0 %v4148_v0 }
  0x94   : > { %2432 = vmatmul.mubr.msk.f32.gmra.mrb[58].mxu0 %vm274_vm1, %v253_v41 }
  0x95   : > { %668 = vmatprep.mubr.f32.mxu0 %v4148_v0 }
  0x98   : > { %2433 = vmatmul.mubr.msk.f32.gmra.mrb[60].mxu0 %vm274_vm1, %v254_v48 }
  0x99   : > { %674 = vmatprep.mubr.f32.mxu0 %v4148_v0 }
  0x9c   : > { %2434 = vmatmul.mubr.msk.f32.gmra.mrb[62].mxu0 %vm274_vm1, %v255_v55 }
  0x9d   : > { %680 = vmatprep.mubr.f32.mxu0 %v4148_v0 }
  0xa0   : > { %2435 = vmatmul.mubr.msk.f32.gmra.mrb[64].mxu0 %vm274_vm1, %v256_v62 }
  0xa1   : > { %686 = vmatprep.mubr.f32.mxu0 %v4148_v0 }
  0xa4   : > { %2436 = vmatmul.mubr.msk.f32.gmra.mrb[66].mxu0 %vm274_vm1, %v257_v9 }
  0xa5   : > { %692 = vmatprep.mubr.f32.mxu0 %v4148_v0 }
  0xa8   : > { %2437 = vmatmul.mubr.msk.f32.gmra.mrb[68].mxu0 %vm274_vm1, %v258_v25 }
  0xa9   : > { %698 = vmatprep.mubr.f32.mxu0 %v4148_v0 }
  0xac   : > { %2438 = vmatmul.mubr.msk.f32.gmra.mrb[70].mxu0 %vm274_vm1, %v259_v36 }
  0xad   : > { %704 = vmatprep.mubr.f32.mxu0 %v4148_v0 }
  0xf3   : > { %v3150_v29 = vpop.f32.mrb[0].mxu0 }
  0xf4   : > { %v3156_v31 = vpop.f32.mrb[1].mxu0 }
  0xf7   : > { %v3159_v32 = vpop.f32.mrb[2].mxu0 }
  0xf8   : > { %v3165_v34 = vpop.f32.mrb[3].mxu0 }
  0xfb   : > { %v502_v35 = vpop.f32.mrb[4].mxu0 }
  0xfc   : > { %v777_v37 = vmax.f32 %v3150_v29, %v502_v35  ;;  %v3173_v38 = vpop.f32.mrb[5].mxu0 }
  0xfd   : > { %v786_v39 = vmax.f32 %v3156_v31, %v3173_v38 }
  0xff   : > { %v508_v40 = vpop.f32.mrb[6].mxu0 }
 0x100   : > { %v778_v42 = vmax.f32 %v3159_v32, %v508_v40  ;;  %v3183_v43 = vpop.f32.mrb[7].mxu0 }
 0x101   : > { %v787_v44 = vmax.f32 %v3165_v34, %v3183_v43 }
 0x102   : > { %v779_v45 = vmax.f32 %v777_v37, %v778_v42 }
 0x103   : > { %v788_v46 = vmax.f32 %v786_v39, %v787_v44  ;;  %v3188_v47 = vpop.f32.mrb[8].mxu0 }
 0x104   : > { %v780_v49 = vrot.slane %v779_v45, 4  ;;  %v3194_v50 = vpop.f32.mrb[9].mxu0 }
 0x105   : > { %v789_v51 = vrot.slane %v788_v46, 4 }
 0x106   : > { %v781_v52 = vmax.f32 %v779_v45, %v780_v49 }
 0x107   : > { %v790_v53 = vmax.f32 %v788_v46, %v789_v51  ;;  %v3197_v54 = vpop.f32.mrb[10].mxu0 }
 0x108   : > { %v782_v56 = vrot.slane %v781_v52, 2  ;;  %v3203_v57 = vpop.f32.mrb[11].mxu0 }
 0x109   : > { %v791_v58 = vrot.slane %v790_v53, 2 }
 0x10a   : > { %v783_v59 = vmax.f32 %v781_v52, %v782_v56 }
 0x10b   : > { %v792_v60 = vmax.f32 %v790_v53, %v791_v58  ;;  %v3206_v61 = vpop.f32.mrb[12].mxu0 }
 0x10c   : > { %v784_v63 = vrot.slane %v783_v59, 1  ;;  %v1071_v1 = vmax.f32 %v3188_v47, %v3206_v61  ;;  %v3214_v3 = vpop.f32.mrb[13].mxu0 }
 0x10d   : > { %v793_v4 = vrot.slane %v792_v60, 1  ;;  %v1080_v5 = vmax.f32 %v3194_v50, %v3214_v3 }
 0x10e   : > { %v785_v6 = vmax.f32 %v783_v59, %v784_v63 }
 0x10f   : > { %v794_v7 = vmax.f32 %v792_v60, %v793_v4  ;;  %v3219_v8 = vpop.f32.mrb[14].mxu0 }
 0x110   : > { %v795_v10 = vsub.f32 %v3150_v29, %v785_v6  ;;  %v797_v11 = vsub.f32 %v3159_v32, %v785_v6  ;;  %v799_v12 = vsub.f32 %v502_v35, %v785_v6  ;;  %v801_v13 = vsub.f32 %v508_v40, %v785_v6  ;;  %v3227_v14 = vpop.f32.mrb[15].mxu0 }
 0x111   : > { %v796_v15 = vsub.f32 %v3156_v31, %v794_v7  ;;  %v798_v16 = vsub.f32 %v3165_v34, %v794_v7  ;;  %v800_v17 = vsub.f32 %v3173_v38, %v794_v7  ;;  %v802_v18 = vsub.f32 %v3183_v43, %v794_v7 }
 0x112   : > { %v803_v19 = vmul.f32 1.442695, %v795_v10  ;;  %v807_v20 = vmul.f32 1.442695, %v797_v11  ;;  %v811_v21 = vmul.f32 1.442695, %v799_v12  ;;  %v1072_v22 = vmax.f32 %v3197_v54, %v3219_v8 }
 0x113   : > { %v815_v23 = vmul.f32 1.442695, %v801_v13  ;;  %v1081_v24 = vmax.f32 %v3203_v57, %v3227_v14  ;;  %v805_v26 = vmul.f32 1.442695, %v796_v15  ;;  %v3242_v28 = vpop.f32.mrb[16].mxu0 }
 0x114   : > { %2675 = vpow2.f32 %v803_v19  ;;  %v1073_v27 = vmax.f32 %v1071_v1, %v1072_v22  ;;  %v809_v29 = vmul.f32 1.442695, %v798_v16  ;;  %v3244_v31 = vpop.f32.mrb[17].mxu0  ;;  %v813_v33 = vmul.f32 1.442695, %v800_v17 }
 0x115   : > { %2677 = vpow2.f32 %v807_v20  ;;  %v1082_v30 = vmax.f32 %v1080_v5, %v1081_v24  ;;  %v817_v39 = vmul.f32 1.442695, %v802_v18 }
 0x116   : > { %2679 = vpow2.f32 %v811_v21  ;;  %v1074_v32 = vrot.slane %v1073_v27, 4 }
 0x117   : > { %2681 = vpow2.f32 %v815_v23  ;;  %v1083_v34 = vrot.slane %v1082_v30, 4  ;;  %v3247_v35 = vpop.f32.mrb[18].mxu0 }
 0x118   : > { %2683 = vpow2.f32 %v805_v26  ;;  %v1075_v37 = vmax.f32 %v1073_v27, %v1074_v32  ;;  %v3253_v38 = vpop.f32.mrb[19].mxu0 }
 0x119   : > { %2685 = vpow2.f32 %v809_v29  ;;  %v1084_v40 = vmax.f32 %v1082_v30, %v1083_v34 }
 0x11a   : > { %v1076_v41 = vrot.slane %v1075_v37, 2  ;;  %2687 = vpow2.f32 %v813_v33 }
 0x11b   : > { %v1085_v42 = vrot.slane %v1084_v40, 2  ;;  %v3256_v43 = vpop.f32.mrb[20].mxu0  ;;  %2689 = vpow2.f32 %v817_v39 }
 0x11c   : > { %v1077_v44 = vmax.f32 %v1075_v37, %v1076_v41  ;;  %v1513_v45 = vmax.f32 %v3242_v28, %v3256_v43  ;;  %v3261_v46 = vpop.f32.mrb[21].mxu0 }
 0x11d   : > { %v1086_v48 = vmax.f32 %v1084_v40, %v1085_v42  ;;  %v1522_v49 = vmax.f32 %v3244_v31, %v3261_v46 }
 0x11e   : > { %v3265_v51 = vpop.eup %2675  ;;  %v1078_v52 = vrot.slane %v1077_v44, 1 }
 0x11f   : > { %v3267_v53 = vpop.eup %2677  ;;  %v1087_v55 = vrot.slane %v1086_v48, 1  ;;  %v3269_v56 = vpop.f32.mrb[22].mxu0 }
 0x120   : > { %v3271_v58 = vpop.eup %2679  ;;  %v819_v59 = vadd.f32 %v3267_v53, %v3265_v51  ;;  %v1079_v60 = vmax.f32 %v1077_v44, %v1078_v52  ;;  %v1514_v62 = vmax.f32 %v3247_v35, %v3269_v56  ;;  %v3277_v63 = vpop.f32.mrb[23].mxu0 }
 0x121   : > { %v3279_v1 = vpop.eup %2681  ;;  %v1088_v4 = vmax.f32 %v1086_v48, %v1087_v55  ;;  %v1523_v5 = vmax.f32 %v3253_v38, %v3277_v63 }
 0x122   : > { %v3283_v6 = vpop.eup %2683  ;;  %v820_v7 = vadd.f32 %v3271_v58, %v819_v59  ;;  %v1089_v9 = vsub.f32 %v3188_v47, %v1079_v60  ;;  %v1091_v10 = vsub.f32 %v3197_v54, %v1079_v60  ;;  %v1093_v11 = vsub.f32 %v3206_v61, %v1079_v60 }
 0x123   : > { %v3289_v12 = vpop.eup %2685  ;;  %v1095_v13 = vsub.f32 %v3219_v8, %v1079_v60  ;;  %v1090_v15 = vsub.f32 %v3194_v50, %v1088_v4  ;;  %v1092_v16 = vsub.f32 %v3203_v57, %v1088_v4  ;;  %v1094_v17 = vsub.f32 %v3214_v3, %v1088_v4  ;;  %v3295_v18 = vpop.f32.mrb[24].mxu0 }
 0x124   : > { %v821_v19 = vadd.f32 %v3279_v1, %v820_v7  ;;  %v828_v47 = vadd.f32 %v3289_v12, %v3283_v6  ;;  %v1097_v54 = vmul.f32 1.442695, %v1089_v9  ;;  %v1101_v20 = vmul.f32 1.442695, %v1091_v10  ;;  %v3300_v61 = vpop.f32.mrb[25].mxu0  ;;  %v3302_v21 = vpop.eup %2687 }
 0x125   : > { %v1105_v8 = vmul.f32 1.442695, %v1093_v11  ;;  %v1109_v22 = vmul.f32 1.442695, %v1095_v13  ;;  %v1096_v50 = vsub.f32 %v3227_v14, %v1088_v4  ;;  %v1099_v23 = vmul.f32 1.442695, %v1090_v15  ;;  %v3306_v24 = vpop.eup %2689 }
 0x126   : > { %v822_v57 = vrot.slane %v821_v19, 4  ;;  %v829_v3 = vadd.f32 %v3302_v21, %v828_v47  ;;  %2691 = vpow2.f32 %v1097_v54  ;;  %v1103_v25 = vmul.f32 1.442695, %v1092_v16 }
 0x127   : > { %2693 = vpow2.f32 %v1101_v20  ;;  %v1515_v26 = vmax.f32 %v1513_v45, %v1514_v62  ;;  %v3308_v27 = vpop.f32.mrb[26].mxu0  ;;  %v1524_v32 = vmax.f32 %v1522_v49, %v1523_v5  ;;  %v1107_v14 = vmul.f32 1.442695, %v1094_v17 }
 0x128   : > { %v823_v29 = vadd.f32 %v822_v57, %v821_v19  ;;  %v830_v30 = vadd.f32 %v3306_v24, %v829_v3  ;;  %2695 = vpow2.f32 %v1105_v8  ;;  %v3311_v33 = vpop.f32.mrb[27].mxu0  ;;  %v1111_v40 = vmul.f32 1.442695, %v1096_v50 }
 0x129   : > { %2697 = vpow2.f32 %v1109_v22  ;;  %v1516_v34 = vrot.slane %v1515_v26, 4  ;;  %v1525_v39 = vrot.slane %v1524_v32, 4 }
 0x12a   : > { %v824_v36 = vrot.slane %v823_v29, 2  ;;  %v831_v37 = vrot.slane %v830_v30, 4  ;;  %2699 = vpow2.f32 %v1099_v23 }
 0x12b   : > { %2701 = vpow2.f32 %v1103_v25  ;;  %v1517_v41 = vmax.f32 %v1515_v26, %v1516_v34  ;;  %v3313_v42 = vpop.f32.mrb[28].mxu0  ;;  %v1526_v48 = vmax.f32 %v1524_v32, %v1525_v39 }
 0x12c   : > { %v825_v44 = vadd.f32 %v824_v36, %v823_v29  ;;  %v832_v45 = vadd.f32 %v831_v37, %v830_v30  ;;  %v3315_v52 = vpop.f32.mrb[29].mxu0  ;;  %2703 = vpow2.f32 %v1107_v14  ;;  %v1883_v55 = vmax.f32 %v3295_v18, %v3313_v42 }
 0x12d   : > { %v1518_v49 = vrot.slane %v1517_v41, 2  ;;  %v1892_v59 = vmax.f32 %v3300_v61, %v3315_v52  ;;  %v1527_v4 = vrot.slane %v1526_v48, 2  ;;  %2705 = vpow2.f32 %v1111_v40 }
 0x12e   : > { %v826_v60 = vrot.slane %v825_v44, 1  ;;  %v833_v62 = vrot.slane %v832_v45, 2 }
 0x12f   : > { %v1519_v5 = vmax.f32 %v1517_v41, %v1518_v49  ;;  %v3321_v7 = vpop.f32.mrb[30].mxu0  ;;  %v1528_v13 = vmax.f32 %v1526_v48, %v1527_v4 }
 0x130   : > { %v3323_v9 = vpop.eup %2691  ;;  %v827_v10 = vadd.f32 %v826_v60, %v825_v44  ;;  %v834_v11 = vadd.f32 %v833_v62, %v832_v45  ;;  %v1884_v15 = vmax.f32 %v3308_v27, %v3321_v7  ;;  %v3327_v16 = vpop.f32.mrb[31].mxu0 }
 0x131   : > { %v3329_v17 = vpop.eup %2693  ;;  %v1520_v19 = vrot.slane %v1519_v5, 1  ;;  %v1893_v47 = vmax.f32 %v3311_v33, %v3327_v16  ;;  %v1529_v22 = vrot.slane %v1528_v13, 1 }
 0x132   : > { %v3333_v54 = vpop.eup %2695  ;;  %2707 = vrcp.f32 %v827_v10  ;;  %v835_v20 = vrot.slane %v834_v11, 1  ;;  %v1113_v8 = vadd.f32 %v3329_v17, %v3323_v9  ;;  %v1885_v3 = vmax.f32 %v1883_v55, %v1884_v15 }
 0x133   : > { %v3337_v50 = vpop.eup %2697  ;;  %v1521_v57 = vmax.f32 %v1519_v5, %v1520_v19  ;;  %v1894_v23 = vmax.f32 %v1892_v59, %v1893_v47  ;;  %v3339_v25 = vpop.f32.mrb[32].mxu0  ;;  %v1530_v32 = vmax.f32 %v1528_v13, %v1529_v22 }
 0x134   : > { %v3341_v26 = vpop.eup %2699  ;;  %v836_v29 = vadd.f32 %v835_v20, %v834_v11  ;;  %v1114_v30 = vadd.f32 %v3333_v54, %v1113_v8  ;;  %v3344_v14 = vpop.f32.mrb[33].mxu0  ;;  %v1886_v47 = vrot.slane %v1885_v3, 4 }
 0x135   : > { %v3346_v34 = vpop.eup %2701  ;;  %v1531_v36 = vsub.f32 %v3242_v28, %v1521_v57  ;;  %v1533_v37 = vsub.f32 %v3247_v35, %v1521_v57  ;;  %v1535_v39 = vsub.f32 %v3256_v43, %v1521_v57  ;;  %v1537_v40 = vsub.f32 %v3269_v56, %v1521_v57 }
 0x136   : > { %2709 = vrcp.f32 %v836_v29  ;;  %v1115_v41 = vadd.f32 %v3337_v50, %v1114_v30  ;;  %v1122_v44 = vadd.f32 %v3346_v34, %v3341_v26  ;;  %v1532_v45 = vsub.f32 %v3244_v31, %v1530_v32  ;;  %v3356_v48 = vpop.eup %2703 }
 0x137   : > { %v1539_v49 = vmul.f32 1.442695, %v1531_v36  ;;  %v1543_v55 = vmul.f32 1.442695, %v1533_v37  ;;  %v1547_v59 = vmul.f32 1.442695, %v1535_v39  ;;  %v1534_v28 = vsub.f32 %v3253_v38, %v1530_v32  ;;  %v3363_v4 = vpop.eup %2705 }
 0x138   : > { %v1116_v35 = vrot.slane %v1115_v41, 4  ;;  %v1123_v43 = vadd.f32 %v3356_v48, %v1122_v44  ;;  %v1551_v60 = vmul.f32 1.442695, %v1537_v40  ;;  %v1536_v56 = vsub.f32 %v3261_v46, %v1530_v32  ;;  %v3361_v62 = vpop.f32.mrb[34].mxu0 }
 0x139   : > { %2711 = vpow2.f32 %v1539_v49  ;;  %v1538_v31 = vsub.f32 %v3277_v63, %v1530_v32  ;;  %v1541_v5 = vmul.f32 1.442695, %v1532_v45  ;;  %v1545_v10 = vmul.f32 1.442695, %v1534_v28  ;;  %v3366_v11 = vpop.f32.mrb[35].mxu0 }
 0x13a   : > { %v1117_v13 = vadd.f32 %v1116_v35, %v1115_v41  ;;  %v1124_v38 = vadd.f32 %v3363_v4, %v1123_v43  ;;  %2713 = vpow2.f32 %v1543_v55  ;;  %v1549_v15 = vmul.f32 1.442695, %v1536_v56 }
 0x13b   : > { %2715 = vpow2.f32 %v1547_v59  ;;  %v1553_v19 = vmul.f32 1.442695, %v1538_v31  ;;  %v1895_v46 = vrot.slane %v1894_v23, 4  ;;  %v3369_v20 = vpop.f32.mrb[36].mxu0  ;;  %v847_v63 = vmax.f32 %v3339_v25, %v3344_v14 }
 0x13c   : > { %v2708_v8 = vpop.eup %2707  ;;  %v1118_v22 = vrot.slane %v1117_v13, 2  ;;  %v1125_v57 = vrot.slane %v1124_v38, 4  ;;  %2717 = vpow2.f32 %v1551_v60  ;;  %v3373_v29 = vpop.f32.mrb[37].mxu0  ;;  %v1887_v30 = vmax.f32 %v1885_v3, %v1886_v47 }
 0x13d   : > { %2719 = vpow2.f32 %v1541_v5  ;;  %v1896_v32 = vmax.f32 %v1894_v23, %v1895_v46  ;;  %v850_v36 = vmax.f32 %v3361_v62, %v3366_v11  ;;  %848 = vmax.xlane.f32.xlu0 %v847_v63  ;;  %v853_v40 = vmax.f32 %v3369_v20, %v3373_v29 }
 0x13e   : > { %v1119_v37 = vadd.f32 %v1118_v22, %v1117_v13  ;;  %v1126_v39 = vadd.f32 %v1125_v57, %v1124_v38  ;;  %2721 = vpow2.f32 %v1545_v10  ;;  %v1888_v41 = vrot.slane %v1887_v30, 2 }
 0x13f   : > { %2723 = vpow2.f32 %v1549_v15  ;;  %v1897_v44 = vrot.slane %v1896_v32, 2  ;;  %v3379_v45 = vpop.f32.mrb[38].mxu0  ;;  %v3382_v49 = vmul.f32 %v2708_v8, %v3265_v51  ;;  %854 = vmax.xlane.f32.xlu1 %v853_v40  ;;  %v3387_v28 = vmul.f32 %v2708_v8, %v3267_v53 }
 0x140   : > { %v2710_v3 = vpop.eup %2709  ;;  %v1120_v23 = vrot.slane %v1119_v37, 1  ;;  %v1127_v55 = vrot.slane %v1126_v39, 2  ;;  %2725 = vpow2.f32 %v1553_v19  ;;  %v3384_v59 = vpop.f32.mrb[39].mxu0  ;;  %v1889_v35 = vmax.f32 %v1887_v30, %v1888_v41 }
 0x141   : > { %4179 = vst [vmem:[#allocation6_spill] sm:$0xff] %v3382_v49  ;;  %4180 = vst [vmem:[#allocation7_spill] sm:$0xff] %v3387_v28  ;;  %v1898_v43 = vmax.f32 %v1896_v32, %v1897_v44  ;;  %v856_v60 = vmax.f32 %v3379_v45, %v3384_v59  ;;  %v3392_v56 = vmul.f32 %v2710_v3, %v3283_v6  ;;  %851 = vmax.xlane.f32.xlu0 %v850_v36 }
 0x142   : > { %v1121_v51 = vadd.f32 %v1120_v23, %v1119_v37  ;;  %v1128_v31 = vadd.f32 %v1127_v55, %v1126_v39  ;;  %v3395_v5 = vmul.f32 %v2710_v3, %v3289_v12  ;;  %v1890_v53 = vrot.slane %v1889_v35, 1 }
 0x143   : > { %4181 = vst [vmem:[#allocation8_spill] sm:$0xff] %v3392_v56  ;;  %v3399_v13 = vpop.eup %2711  ;;  %v1899_v38 = vrot.slane %v1898_v43, 1  ;;  %v3402_v15 = vmul.f32 %v2710_v3, %v3302_v21  ;;  %v3405_v19 = vmul.f32 %v2710_v3, %v3306_v24  ;;  %857 = vmax.xlane.f32.xlu1 %v856_v60  ;;  %v3412_v46 = vmul.f32 %v2708_v8, %v3271_v58 }
 0x144   : > { %v3407_v6 = vpop.eup %2713  ;;  %2727 = vrcp.f32 %v1121_v51  ;;  %v1129_v47 = vrot.slane %v1128_v31, 1  ;;  %v1891_v57 = vmax.f32 %v1889_v35, %v1890_v53  ;;  %v3423_v36 = vmul.f32 %v2708_v8, %v3279_v1 }
 0x145   : > { %4182 = vst [vmem:[#allocation9_spill] sm:$0xff] %v3402_v15  ;;  %4183 = vst [vmem:[#allocation10_spill] sm:$0xff] %v3405_v19  ;;  %v3414_v22 = vpop.eup %2715  ;;  %v1555_v21 = vadd.f32 %v3407_v6, %v3399_v13  ;;  %v1900_v63 = vmax.f32 %v1898_v43, %v1899_v38 }
 0x146   : > { %4184 = vst [vmem:[#allocation11_spill] sm:$0xff] %v3412_v46  ;;  %v3420_v30 = vpop.eup %2717  ;;  %v1130_v32 = vadd.f32 %v1129_v47, %v1128_v31  ;;  %4185 = vst [vmem:[#allocation12_spill] sm:$0xff] %v3423_v36  ;;  %v1901_v39 = vsub.f32 %v3295_v18, %v1891_v57  ;;  %v1903_v40 = vsub.f32 %v3308_v27, %v1891_v57 }
 0x147   : > { %v3425_v37 = vpop.eup %2719  ;;  %v1556_v58 = vadd.f32 %v3414_v22, %v1555_v21  ;;  %v1905_v41 = vsub.f32 %v3313_v42, %v1891_v57  ;;  %v1907_v3 = vsub.f32 %v3321_v7, %v1891_v57  ;;  %v1902_v23 = vsub.f32 %v3300_v61, %v1900_v63  ;;  %v3484_v21 = vpop.f32.mrb[40].mxu0 }
 0x148   : > { %v3431_v44 = vpop.eup %2721  ;;  %2729 = vrcp.f32 %v1130_v32  ;;  %v1904_v1 = vsub.f32 %v3311_v33, %v1900_v63  ;;  %v1909_v35 = vmul.f32 1.442695, %v1901_v39  ;;  %v1913_v27 = vmul.f32 1.442695, %v1903_v40 }
 0x149   : > { %v3436_v8 = vpop.eup %2723  ;;  %v1557_v55 = vadd.f32 %v3420_v30, %v1556_v58  ;;  %v1564_v18 = vadd.f32 %v3431_v44, %v3425_v37  ;;  %v1917_v42 = vmul.f32 1.442695, %v1905_v41  ;;  %v1921_v60 = vmul.f32 1.442695, %v1907_v3 }
 0x14a   : > { %v3441_v43 = vpop.eup %2725  ;;  %v1906_v51 = vsub.f32 %v3315_v52, %v1900_v63  ;;  %v1908_v7 = vsub.f32 %v3327_v16, %v1900_v63  ;;  %2731 = vpow2.f32 %v1909_v35  ;;  %v1911_v31 = vmul.f32 1.442695, %v1902_v23 }
 0x14b   : > { %v1558_v61 = vrot.slane %v1557_v55, 4  ;;  %v1565_v33 = vadd.f32 %v3436_v8, %v1564_v18  ;;  %2733 = vpow2.f32 %v1913_v27  ;;  %v1915_v53 = vmul.f32 1.442695, %v1904_v1 }
 0x14c   : > { %2735 = vpow2.f32 %v1917_v42  ;;  %v1919_v32 = vmul.f32 1.442695, %v1906_v51  ;;  %v1923_v52 = vmul.f32 1.442695, %v1908_v7 }
 0x14d   : > { %v1559_v38 = vadd.f32 %v1558_v61, %v1557_v55  ;;  %v1566_v47 = vadd.f32 %v3441_v43, %v1565_v33  ;;  %2737 = vpow2.f32 %v1921_v60 }
 0x14e   : > { %v2728_v57 = vpop.eup %2727  ;;  %2739 = vpow2.f32 %v1911_v31 }
 0x14f   : > { %v1560_v58 = vrot.slane %v1559_v38, 2  ;;  %v1567_v16 = vrot.slane %v1566_v47, 4  ;;  %v3450_v63 = vmul.f32 %v2728_v57, %v3323_v9  ;;  %2741 = vpow2.f32 %v1915_v53 }
 0x150   : > { %v3453_v39 = vmul.f32 %v2728_v57, %v3329_v17  ;;  %v3456_v40 = vmul.f32 %v2728_v57, %v3333_v54  ;;  %v3459_v41 = vmul.f32 %v2728_v57, %v3337_v50  ;;  %2743 = vpow2.f32 %v1919_v32 }
 0x151   : > { %v1561_v3 = vadd.f32 %v1560_v58, %v1559_v38  ;;  %v1568_v23 = vadd.f32 %v1567_v16, %v1566_v47  ;;  %2745 = vpow2.f32 %v1923_v52 }
 0x152   : > { %v2730_v1 = vpop.eup %2729 }
 0x153   : > { %v1562_v18 = vrot.slane %v1561_v3, 1  ;;  %v1569_v35 = vrot.slane %v1568_v23, 2  ;;  %v3466_v17 = vmul.f32 %v2730_v1, %v3341_v26  ;;  %v3469_v54 = vmul.f32 %v2730_v1, %v3346_v34 }
 0x154   : > { %v3472_v50 = vmul.f32 %v2730_v1, %v3356_v48  ;;  %v3475_v27 = vmul.f32 %v2730_v1, %v3363_v4  ;;  %v3477_v42 = vpop.eup %2731 }
 0x155   : > { %v1563_v60 = vadd.f32 %v1562_v18, %v1561_v3  ;;  %v1570_v51 = vadd.f32 %v1569_v35, %v1568_v23  ;;  %v2734_v61 = vpop.eup %2733 }
 0x156   : > { %v2736_v34 = vpop.eup %2735  ;;  %v1925_v48 = vadd.f32 %v2734_v61, %v3477_v42 }
 0x157   : > { %2747 = vrcp.f32 %v1563_v60  ;;  %v1571_v33 = vrot.slane %v1570_v51, 1  ;;  %v2738_v31 = vpop.eup %2737 }
 0x158   : > { %v2740_v53 = vpop.eup %2739  ;;  %v1926_v38 = vadd.f32 %v2736_v34, %v1925_v48 }
 0x159   : > { %v1572_v4 = vadd.f32 %v1571_v33, %v1570_v51  ;;  %v2742_v47 = vpop.eup %2741 }
 0x15a   : > { %v1927_v57 = vadd.f32 %v2738_v31, %v1926_v38  ;;  %v1934_v32 = vadd.f32 %v2742_v47, %v2740_v53  ;;  %v2744_v52 = vpop.eup %2743 }
 0x15b   : > { %2749 = vrcp.f32 %v1572_v4  ;;  %v2746_v3 = vpop.eup %2745 }
 0x15c   : > { %v1928_v58 = vrot.slane %v1927_v57, 4  ;;  %v1935_v16 = vadd.f32 %v2744_v52, %v1934_v32 }
 0x15e   : > { %v1929_v23 = vadd.f32 %v1928_v58, %v1927_v57  ;;  %v1936_v1 = vadd.f32 %v2746_v3, %v1935_v16  ;;  %v3498_v57 = vpop.f32.mrb[41].mxu0 }
 0x15f   : > { %v3500_v32 = vpop.f32.mrb[42].mxu0 }
 0x160   : > { %v1930_v35 = vrot.slane %v1929_v23, 2  ;;  %v1937_v60 = vrot.slane %v1936_v1, 4 }
 0x161   : > { %v2748_v18 = vpop.eup %2747 }
 0x162   : > { %v3487_v24 = vmul.f32 %v2748_v18, %v3399_v13  ;;  %v3490_v51 = vmul.f32 %v2748_v18, %v3407_v6  ;;  %v3493_v33 = vmul.f32 %v2748_v18, %v3414_v22  ;;  %v3496_v48 = vmul.f32 %v2748_v18, %v3420_v30  ;;  %v3506_v22 = vpop.f32.mrb[43].mxu0 }
 0x163   : > { %v1931_v4 = vadd.f32 %v1930_v35, %v1929_v23  ;;  %v1938_v38 = vadd.f32 %v1937_v60, %v1936_v1  ;;  %v3524_v12 = vpop.f32.mrb[44].mxu0 }
 0x164   : > { %4186 = vst [vmem:[#allocation13_spill] sm:$0xff] %v3487_v24  ;;  %4187 = vst [vmem:[#allocation14_spill] sm:$0xff] %v3490_v51 }
 0x165   : > { %4188 = vst [vmem:[#allocation15_spill] sm:$0xff] %v3493_v33  ;;  %4189 = vst [vmem:[#allocation16_spill] sm:$0xff] %v3496_v48  ;;  %v2750_v6 = vpop.eup %2749  ;;  %v1932_v16 = vrot.slane %v1931_v4, 1  ;;  %v1939_v10 = vrot.slane %v1938_v38, 2 }
 0x166   : > { %v3513_v1 = vmul.f32 %v2750_v6, %v3425_v37  ;;  %v3516_v18 = vmul.f32 %v2750_v6, %v3431_v44  ;;  %v3519_v13 = vmul.f32 %v2750_v6, %v3436_v8  ;;  %v3522_v58 = vmul.f32 %v2750_v6, %v3441_v43  ;;  %v3528_v37 = vpop.f32.mrb[45].mxu0 }
 0x167   : > { %v1933_v35 = vadd.f32 %v1932_v16, %v1931_v4  ;;  %v1940_v60 = vadd.f32 %v1939_v10, %v1938_v38  ;;  %v3534_v4 = vpop.f32.mrb[46].mxu0 }
 0x168   : > { %4190 = vst [vmem:[#allocation17_spill] sm:$0xff] %v3513_v1  ;;  %4191 = vst [vmem:[#allocation18_spill] sm:$0xff] %v3516_v18  ;;  %v3536_v43 = vpop.f32.mrb[47].mxu0 }
 0x169   : > { %4192 = vst [vmem:[#allocation19_spill] sm:$0xff] %v3519_v13  ;;  %4193 = vst [vmem:[#allocation20_spill] sm:$0xff] %v3522_v58  ;;  %2751 = vrcp.f32 %v1933_v35  ;;  %v1941_v26 = vrot.slane %v1940_v60, 1 }
 0x16b   : > { %v1942_v8 = vadd.f32 %v1941_v26, %v1940_v60 }
 0x16d   : > { %2753 = vrcp.f32 %v1942_v8 }
 0x173   : > { %v2752_v6 = vpop.eup %2751 }
 0x174   : > { %v3541_v16 = vmul.f32 %v2752_v6, %v3477_v42  ;;  %v3543_v35 = vmul.f32 %v2752_v6, %v2734_v61  ;;  %v3545_v9 = vmul.f32 %v2752_v6, %v2736_v34  ;;  %v3547_v44 = vmul.f32 %v2752_v6, %v2738_v31 }
 0x176   : > { %4194 = vst [vmem:[#allocation21_spill] sm:$0xff] %v3541_v16  ;;  %4195 = vst [vmem:[#allocation22_spill] sm:$0xff] %v3543_v35 }
 0x177   : > { %4196 = vst [vmem:[#allocation23_spill] sm:$0xff] %v3545_v9  ;;  %4197 = vst [vmem:[#allocation24_spill] sm:$0xff] %v3547_v44  ;;  %v2754_v8 = vpop.eup %2753 }
 0x178   : > { %v3553_v55 = vmul.f32 %v2754_v8, %v2740_v53  ;;  %v3555_v7 = vmul.f32 %v2754_v8, %v2742_v47  ;;  %v3557_v0 = vmul.f32 %v2754_v8, %v2744_v52  ;;  %v3559_v42 = vmul.f32 %v2754_v8, %v2746_v3 }
 0x17a   : > { %4198 = vst [vmem:[#allocation25_spill] sm:$0xff] %v3553_v55  ;;  %4199 = vst [vmem:[#allocation26_spill] sm:$0xff] %v3555_v7 }
 0x17b   : > { %4200 = vst [vmem:[#allocation27_spill] sm:$0xff] %v3557_v0  ;;  %4201 = vst [vmem:[#allocation28_spill] sm:$0xff] %v3559_v42 }
 0x1ca   : > { %v849_v31 = vpop.xlane.xlu0 %848 }
 0x1cb   : > { %v859_v6 = vsub.f32 %v3339_v25, %v849_v31  ;;  %v860_v60 = vsub.f32 %v3344_v14, %v849_v31 }
 0x1cc   : > { %v855_v26 = vpop.xlane.xlu1 %854 }
 0x1cd   : > { %v867_v53 = vmul.f32 1.442695, %v859_v6  ;;  %v869_v38 = vmul.f32 1.442695, %v860_v60  ;;  %v863_v47 = vsub.f32 %v3369_v20, %v855_v26  ;;  %v864_v52 = vsub.f32 %v3373_v29, %v855_v26 }
 0x1ce   : > { %v852_v3 = vpop.xlane.xlu0 %851  ;;  %v4202_v6 = vmax.f32 %v3484_v21, %v3498_v57 }
 0x1cf   : > { %2755 = vpow2.f32 %v867_v53  ;;  %v861_v8 = vsub.f32 %v3361_v62, %v852_v3  ;;  %v862_v61 = vsub.f32 %v3366_v11, %v852_v3  ;;  %v875_v10 = vmul.f32 1.442695, %v863_v47 }
 0x1d0   : > { %2757 = vpow2.f32 %v869_v38  ;;  %v877_v34 = vmul.f32 1.442695, %v864_v52  ;;  %v858_v23 = vpop.xlane.xlu1 %857  ;;  %v4203_v53 = vmax.f32 %v3500_v32, %v3506_v22  ;;  %v4204_v47 = vmax.f32 %v3524_v12, %v3528_v37  ;;  %v3606_v52 = vpop.f32.mrb[48].mxu0 }
 0x1d1   : > { %v871_v25 = vmul.f32 1.442695, %v861_v8  ;;  %v873_v30 = vmul.f32 1.442695, %v862_v61  ;;  %2759 = vpow2.f32 %v875_v10  ;;  %v865_v14 = vsub.f32 %v3379_v45, %v858_v23  ;;  %v3608_v3 = vpop.f32.mrb[49].mxu0 }
 0x1d2   : > { %2761 = vpow2.f32 %v877_v34  ;;  %v866_v20 = vsub.f32 %v3384_v59, %v858_v23  ;;  %v4205_v8 = vmax.f32 %v3534_v4, %v3536_v43 }
 0x1d3   : > { %2763 = vpow2.f32 %v871_v25  ;;  %v879_v29 = vmul.f32 1.442695, %v865_v14  ;;  %v3613_v25 = vpop.f32.mrb[50].mxu0 }
 0x1d4   : > { %2765 = vpow2.f32 %v873_v30  ;;  %v881_v26 = vmul.f32 1.442695, %v866_v20  ;;  %v3615_v14 = vpop.f32.mrb[51].mxu0 }
 0x1d5   : > { %2767 = vpow2.f32 %v879_v29  ;;  %v3617_v20 = vpop.f32.mrb[52].mxu0 }
 0x1d6   : > { %2769 = vpow2.f32 %v881_v26  ;;  %v3621_v26 = vpop.f32.mrb[53].mxu0 }
 0x1d9   : > { %v3573_v62 = vpop.eup %2755 }
 0x1da   : > { %v3575_v11 = vpop.eup %2757 }
 0x1db   : > { %v3577_v38 = vpop.eup %2759  ;;  %v883_v10 = vadd.f32 %v3575_v11, %v3573_v62 }
 0x1dc   : > { %v3581_v60 = vpop.eup %2761 }
 0x1dd   : > { %v3583_v45 = vpop.eup %2763  ;;  %884 = vadd.xlane.f32.xlu0 %v883_v10  ;;  %v889_v59 = vadd.f32 %v3581_v60, %v3577_v38  ;;  %v268_v10 = vld [vmem:[%s4143_s1 + $0x160] sm:$0xff] }
 0x1de   : > { %v3587_v30 = vpop.eup %2765 }
 0x1df   : > { %v3589_v23 = vpop.eup %2767  ;;  %v886_v61 = vadd.f32 %v3587_v30, %v3583_v45 }
 0x1e0   : > { %v3593_v34 = vpop.eup %2769 }
 0x1e1   : > { %887 = vadd.xlane.f32.xlu1 %v886_v61  ;;  %890 = vadd.xlane.f32.xlu0 %v889_v59  ;;  %v892_v31 = vadd.f32 %v3593_v34, %v3589_v23  ;;  %v3625_v59 = vpop.f32.mrb[54].mxu0  ;;  %v267_v61 = vld [vmem:[%s4143_s1 + $0x158] sm:$0xff] }
 0x1e2   : > { %2446 = vmatmul.mubr.msk.f32.vlgmr.msra.gmra.mrb[0].mxu1 %vm274_vm1, %v267_v61  ;;  %v269_v61 = vld [vmem:[%s4143_s1 + $0x168] sm:$0xff] }
 0x1e5   : > { %893 = vadd.xlane.f32.xlu1 %v892_v31  ;;  %1142 = vmax.xlane.f32.xlu0 %v4202_v6  ;;  %v3630_v31 = vpop.f32.mrb[55].mxu0 }
 0x1e9   : > { %1145 = vmax.xlane.f32.xlu1 %v4203_v53  ;;  %1148 = vmax.xlane.f32.xlu0 %v4204_v47  ;;  %v4206_v53 = vmov 0.0  }
 0x1ea   : > { %752 = vmatprep.mubr.f32.mxu1 %v4206_v53 }
 0x1eb   : > { %2447 = vmatmul.mubr.msk.f32.gmra.mrb[2].mxu1 %vm274_vm1, %v268_v10  ;;  %v270_v10 = vld [vmem:[%s4143_s1 + $0x170] sm:$0xff] }
 0x1ec   : > { %758 = vmatprep.mubr.f32.mxu1 %v4206_v53 }
 0x1ed   : > { %1151 = vmax.xlane.f32.xlu1 %v4205_v8  ;;  %v3638_v8 = vpop.f32.mrb[56].mxu0 }
 0x1ee   : > { %v3643_v29 = vpop.f32.mrb[57].mxu0 }
 0x1ef   : > { %v3646_v2 = vpop.f32.mrb[58].mxu0  ;;  %2448 = vmatmul.mubr.msk.f32.gmra.mrb[4].mxu1 %vm274_vm1, %v269_v61  ;;  %v271_v61 = vld [vmem:[%s4143_s1 + $0x178] sm:$0xff] }
 0x1f0   : > { %v3652_v6 = vpop.f32.mrb[59].mxu0  ;;  %764 = vmatprep.mubr.f32.mxu1 %v4206_v53 }
 0x1f1   : > { %v3656_v9 = vpop.f32.mrb[60].mxu0 }
 0x1f2   : > { %v3659_v44 = vpop.f32.mrb[61].mxu0 }
 0x1f3   : > { %v3665_v0 = vpop.f32.mrb[62].mxu0  ;;  %2449 = vmatmul.mubr.msk.f32.gmra.mrb[6].mxu1 %vm274_vm1, %v270_v10  ;;  %v262_v10 = vld [vmem:[%s4143_s1 + $0x130] sm:$0xff] }
 0x1f4   : > { %v3667_v42 = vpop.f32.mrb[63].mxu0  ;;  %770 = vmatprep.mubr.f32.mxu1 %v4206_v53 }
 0x1f5   : > { %v3672_v47 = vpop.f32.mrb[64].mxu0 }
 0x1f6   : > { %v684_v35 = vpop.f32.mrb[65].mxu0 }
 0x1f7   : > { %2450 = vmatmul.mubr.msk.f32.gmra.mrb[8].mxu1 %vm274_vm1, %v271_v61  ;;  %v3681_v7 = vpop.f32.mrb[66].mxu0  ;;  %v260_v61 = vld [vmem:[%s4143_s1 + $0x120] sm:$0xff] }
 0x1f8   : > { %971 = vmatprep.mubr.f32.mxu1 %v684_v35  ;;  %v3685_v16 = vpop.f32.mrb[67].mxu0  ;;  %2439 = vmatmul.mubr.msk.f32.gmra.mrb[72].mxu0 %vm274_vm1, %v260_v61  ;;  %v261_v35 = vld [vmem:[%s4143_s1 + $0x128] sm:$0xff]  ;;  %v263_v61 = vld [vmem:[%s4143_s1 + $0x138] sm:$0xff] }
 0x1f9   : > { %v3687_v33 = vpop.f32.mrb[68].mxu0  ;;  %710 = vmatprep.mubr.f32.mxu0 %v4206_v53 }
 0x1fa   : > { %v3689_v48 = vpop.f32.mrb[69].mxu0 }
 0x1fb   : > { %v3691_v13 = vpop.f32.mrb[70].mxu0 }
 0x1fc   : > { %v3693_v58 = vpop.f32.mrb[71].mxu0  ;;  %2440 = vmatmul.mubr.msk.f32.gmra.mrb[74].mxu0 %vm274_vm1, %v261_v35 }
 0x1fd   : > { %716 = vmatprep.mubr.f32.mxu0 %v4206_v53 }
 0x200   : > { %2441 = vmatmul.mubr.msk.f32.gmra.mrb[76].mxu0 %vm274_vm1, %v262_v10 }
 0x201   : > { %722 = vmatprep.mubr.f32.mxu0 %v4206_v53 }
 0x204   : > { %2442 = vmatmul.mubr.msk.f32.gmra.mrb[78].mxu0 %vm274_vm1, %v263_v61 }
 0x205   : > { %728 = vmatprep.mubr.f32.mxu0 %v4206_v53 }
 0x26a   : > { %v885_v55 = vpop.xlane.xlu0 %884 }
 0x26b   : > { %2771 = vrcp.f32 %v885_v55 }
 0x26e   : > { %v888_v35 = vpop.xlane.xlu1 %887  ;;  %v891_v24 = vpop.xlane.xlu0 %890 }
 0x26f   : > { %2773 = vrcp.f32 %v888_v35 }
 0x270   : > { %2775 = vrcp.f32 %v891_v24 }
 0x272   : > { %v894_v51 = vpop.xlane.xlu1 %893  ;;  %v1143_v1 = vpop.xlane.xlu0 %1142 }
 0x273   : > { %2777 = vrcp.f32 %v894_v51  ;;  %v1153_v10 = vsub.f32 %v3484_v21, %v1143_v1  ;;  %v1154_v18 = vsub.f32 %v3498_v57, %v1143_v1 }
 0x275   : > { %v1161_v46 = vmul.f32 1.442695, %v1153_v10  ;;  %v1163_v36 = vmul.f32 1.442695, %v1154_v18  ;;  %v2772_v15 = vpop.eup %2771 }
 0x276   : > { %v1146_v19 = vpop.xlane.xlu1 %1145  ;;  %v1149_v61 = vpop.xlane.xlu0 %1148  ;;  %v900_v57 = vmul.f32 %v2772_v15, %v3575_v11 }
 0x277   : > { %2779 = vpow2.f32 %v1161_v46  ;;  %v1155_v49 = vsub.f32 %v3500_v32, %v1146_v19  ;;  %v1156_v55 = vsub.f32 %v3506_v22, %v1146_v19  ;;  %v1157_v35 = vsub.f32 %v3524_v12, %v1149_v61 }
 0x278   : > { %2781 = vpow2.f32 %v1163_v36  ;;  %v1158_v24 = vsub.f32 %v3528_v37, %v1149_v61  ;;  %v899_v46 = vmul.f32 %v2772_v15, %v3573_v62 }
 0x279   : > { %v2774_v51 = vpop.eup %2773  ;;  %v1165_v28 = vmul.f32 1.442695, %v1155_v49  ;;  %v1167_v21 = vmul.f32 1.442695, %v1156_v55  ;;  %v1169_v56 = vmul.f32 1.442695, %v1157_v35 }
 0x27a   : > { %v1171_v1 = vmul.f32 1.442695, %v1158_v24  ;;  %v902_v18 = vmul.f32 %v2774_v51, %v3587_v30  ;;  %v1152_v10 = vpop.xlane.xlu1 %1151  ;;  %v901_v32 = vmul.f32 %v2774_v51, %v3583_v45  ;;  %v2776_v19 = vpop.eup %2775 }
 0x27b   : > { %2783 = vpow2.f32 %v1165_v28  ;;  %v1159_v12 = vsub.f32 %v3534_v4, %v1152_v10  ;;  %v1160_v36 = vsub.f32 %v3536_v43, %v1152_v10  ;;  %v904_v30 = vmul.f32 %v2776_v19, %v3581_v60 }
 0x27c   : > { %2785 = vpow2.f32 %v1167_v21  ;;  %v2533_v49 = vpack.c.bf16 %v902_v18, %v900_v57  ;;  %v2535_v22 = vpack.c.bf16 %v901_v32, %v899_v46  ;;  %v903_v62 = vmul.f32 %v2776_v19, %v3577_v38 }
 0x27d   : > { %v2778_v37 = vpop.eup %2777  ;;  %2787 = vpow2.f32 %v1169_v56  ;;  %v1173_v11 = vmul.f32 1.442695, %v1159_v12  ;;  %v1175_v61 = vmul.f32 1.442695, %v1160_v36  ;;  %v4208_v18 = vmax.f32 %v3613_v25, %v3615_v14 }
 0x27e   : > { %2789 = vpow2.f32 %v1171_v1  ;;  %2534 = vmatprep.subr.bf16.mxu1 %v2533_v49  ;;  %v906_v15 = vmul.f32 %v2778_v37, %v3593_v34  ;;  %v905_v28 = vmul.f32 %v2778_v37, %v3589_v23  ;;  %v4207_v1 = vmax.f32 %v3606_v52, %v3608_v3 }
 0x27f   : > { %2791 = vpow2.f32 %v1173_v11  ;;  %2536 = vmatpush1.bf16.xpose.msra.mxu1 %v2535_v22  ;;  %v4209_v10 = vmax.f32 %v3617_v20, %v3621_v26 }
 0x280   : > { %2793 = vpow2.f32 %v1175_v61  ;;  %v2537_v4 = vpack.c.bf16 %v906_v15, %v904_v30  ;;  %v2539_v56 = vpack.c.bf16 %v905_v28, %v903_v62 }
 0x281   : > { %v3730_v43 = vpop.eup %2779 }
 0x282   : > { %v3733_v45 = vpop.eup %2781  ;;  %2538 = vmatprep.subr.bf16.mxu1 %v2537_v4 }
 0x283   : > { %v1177_v55 = vadd.f32 %v3733_v45, %v3730_v43 }
 0x285   : > { %v3737_v60 = vpop.eup %2783  ;;  %1178 = vadd.xlane.f32.xlu0 %v1177_v55 }
 0x286   : > { %v3739_v34 = vpop.eup %2785 }
 0x287   : > { %v3741_v35 = vpop.eup %2787  ;;  %2540 = vmatpush1.bf16.xpose.msra.mxu1 %v2539_v56  ;;  %v1180_v23 = vadd.f32 %v3739_v34, %v3737_v60 }
 0x288   : > { %v3745_v24 = vpop.eup %2789 }
 0x289   : > { %v3747_v38 = vpop.eup %2791  ;;  %v1183_v51 = vadd.f32 %v3745_v24, %v3741_v35  ;;  %1181 = vadd.xlane.f32.xlu1 %v1180_v23 }
 0x28a   : > { %v3751_v21 = vpop.eup %2793 }
 0x28b   : > { %1184 = vadd.xlane.f32.xlu0 %v1183_v51  ;;  %v1186_v57 = vadd.f32 %v3751_v21, %v3747_v38 }
 0x28d   : > { %1187 = vadd.xlane.f32.xlu1 %v1186_v57 }
 0x28e   : > { %972 = vmatmul.mubr.f32.vlgmr.msra.gmra.mrb[10].mxu1 %v3672_v47  ;;  %v4210_v47 = vmax.f32 %v3625_v59, %v3630_v31 }
 0x28f   : > { %1584 = vmax.xlane.f32.xlu0 %v4207_v1  ;;  %976 = vmatprep.mubr.f32.mxu1 %v3685_v16 }
 0x291   : > { %1587 = vmax.xlane.f32.xlu1 %v4208_v18 }
 0x292   : > { %977 = vmatmul.mubr.f32.gmra.mrb[12].mxu1 %v3681_v7 }
 0x293   : > { %1590 = vmax.xlane.f32.xlu0 %v4209_v10  ;;  %981 = vmatprep.mubr.f32.mxu1 %v3689_v48 }
 0x295   : > { %1593 = vmax.xlane.f32.xlu1 %v4210_v47 }
 0x296   : > { %982 = vmatmul.mubr.f32.gmra.mrb[14].mxu1 %v3687_v33 }
 0x297   : > { %986 = vmatprep.mubr.f32.mxu1 %v3693_v58 }
 0x29a   : > { %987 = vmatmul.mubr.f32.gmra.mrb[16].mxu1 %v3691_v13  ;;  %v4174_v13 = vmov 0.0|0.0  }
 0x29b   : > { %2541 = vmatprep.subr.bf16.mxu1 %v4174_v13  ;;  %2497 = vmatprep.mubr.msk.f32.mxu1 %vm2922_vm2, %v4206_v53 }
 0x2b5   : > { %v3774_v16 = vpop.f32.mrb[0].mxu1 }
 0x2b6   : > { %v3776_v46 = vpop.f32.mrb[1].mxu1 }
 0x2be   : > { %v3778_v7 = vpop.f32.mrb[2].mxu1 }
 0x2bf   : > { %v3780_v32 = vpop.f32.mrb[3].mxu1 }
 0x2c2   : > { %v3782_v19 = vpop.f32.mrb[4].mxu1 }
 0x2c3   : > { %v3784_v48 = vpop.f32.mrb[5].mxu1 }
 0x2c6   : > { %v3786_v12 = vpop.f32.mrb[6].mxu1 }
 0x2c7   : > { %v3788_v36 = vpop.f32.mrb[7].mxu1 }
 0x2ca   : > { %v3790_v33 = vpop.f32.mrb[8].mxu1 }
 0x2cb   : > { %4211 = vst [vmem:[#allocation29_spill] sm:$0xff] %v3790_v33  ;;  %v3792_v58 = vpop.f32.mrb[9].mxu1  ;;  %v3797_v49 = vpop.f32.mrb[72].mxu0 }
 0x2cc   : > { %4212 = vst [vmem:[#allocation30_spill] sm:$0xff] %v3792_v58  ;;  %v3799_v22 = vpop.f32.mrb[73].mxu0 }
 0x2cf   : > { %v3801_v37 = vpop.f32.mrb[74].mxu0 }
 0x2d0   : > { %v3803_v11 = vpop.f32.mrb[75].mxu0 }
 0x2d3   : > { %v3805_v61 = vpop.f32.mrb[76].mxu0 }
 0x2d4   : > { %v3807_v30 = vpop.f32.mrb[77].mxu0 }
 0x2d7   : > { %v3809_v15 = vpop.f32.mrb[78].mxu0 }
 0x2d8   : > { %v3811_v4 = vpop.f32.mrb[79].mxu0 }
 0x312   : > { %v1179_v28 = vpop.xlane.xlu0 %1178 }
 0x313   : > { %2795 = vrcp.f32 %v1179_v28 }
 0x316   : > { %v1182_v62 = vpop.xlane.xlu1 %1181 }
 0x317   : > { %2797 = vrcp.f32 %v1182_v62 }
 0x318   : > { %v1185_v56 = vpop.xlane.xlu0 %1184 }
 0x319   : > { %2799 = vrcp.f32 %v1185_v56 }
 0x31a   : > { %v1188_v55 = vpop.xlane.xlu1 %1187 }
 0x31b   : > { %2801 = vrcp.f32 %v1188_v55 }
 0x31c   : > { %v1585_v23 = vpop.xlane.xlu0 %1584 }
 0x31d   : > { %v2796_v51 = vpop.eup %2795  ;;  %v1595_v57 = vsub.f32 %v3606_v52, %v1585_v23  ;;  %v1596_v1 = vsub.f32 %v3608_v3, %v1585_v23 }
 0x31e   : > { %v1588_v18 = vpop.xlane.xlu1 %1587  ;;  %v3818_v62 = vmul.f32 %v2796_v51, %v3733_v45  ;;  %v3821_v56 = vmul.f32 %v2796_v51, %v3730_v43 }
 0x31f   : > { %v1603_v10 = vmul.f32 1.442695, %v1595_v57  ;;  %v1605_v47 = vmul.f32 1.442695, %v1596_v1  ;;  %v1597_v13 = vsub.f32 %v3613_v25, %v1588_v18  ;;  %v1598_v33 = vsub.f32 %v3615_v14, %v1588_v18 }
 0x320   : > { %v1591_v28 = vpop.xlane.xlu0 %1590 }
 0x321   : > { %v2798_v55 = vpop.eup %2797  ;;  %2803 = vpow2.f32 %v1603_v10  ;;  %v1607_v58 = vmul.f32 1.442695, %v1597_v13  ;;  %v1609_v52 = vmul.f32 1.442695, %v1598_v33  ;;  %v1599_v3 = vsub.f32 %v3617_v20, %v1591_v28 }
 0x322   : > { %2805 = vpow2.f32 %v1605_v47  ;;  %v1600_v23 = vsub.f32 %v3621_v26, %v1591_v28  ;;  %v1594_v57 = vpop.xlane.xlu1 %1593  ;;  %v3826_v25 = vmul.f32 %v2798_v55, %v3739_v34  ;;  %v3829_v14 = vmul.f32 %v2798_v55, %v3737_v60 }
 0x323   : > { %v2800_v45 = vpop.eup %2799  ;;  %2807 = vpow2.f32 %v1607_v58  ;;  %v1611_v43 = vmul.f32 1.442695, %v1599_v3  ;;  %v1601_v51 = vsub.f32 %v3625_v59, %v1594_v57  ;;  %v1602_v13 = vsub.f32 %v3630_v31, %v1594_v57 }
 0x324   : > { %2809 = vpow2.f32 %v1609_v52  ;;  %v1613_v33 = vmul.f32 1.442695, %v1600_v23  ;;  %v2547_v20 = vpack.c.bf16 %v3826_v25, %v3818_v62  ;;  %v2549_v26 = vpack.c.bf16 %v3829_v14, %v3821_v56 }
 0x325   : > { %v2802_v34 = vpop.eup %2801  ;;  %2811 = vpow2.f32 %v1611_v43  ;;  %v1615_v1 = vmul.f32 1.442695, %v1601_v51  ;;  %v1617_v60 = vmul.f32 1.442695, %v1602_v13  ;;  %v1198_v18 = vmul.f32 %v2800_v45, %v3745_v24 }
 0x326   : > { %2813 = vpow2.f32 %v1613_v33  ;;  %v1200_v58 = vmul.f32 %v2802_v34, %v3751_v21  ;;  %v1197_v59 = vmul.f32 %v2800_v45, %v3741_v35  ;;  %v1199_v31 = vmul.f32 %v2802_v34, %v3747_v38 }
 0x327   : > { %2815 = vpow2.f32 %v1615_v1  ;;  %v4213_v25 = vmax.f32 %v3638_v8, %v3643_v29  ;;  %v4214_v14 = vmax.f32 %v3646_v2, %v3652_v6  ;;  %v4215_v45 = vmax.f32 %v3656_v9, %v3659_v44 }
 0x328   : > { %2817 = vpow2.f32 %v1617_v60  ;;  %v2551_v10 = vpack.c.bf16 %v1200_v58, %v1198_v18  ;;  %v2553_v47 = vpack.c.bf16 %v1199_v31, %v1197_v59  ;;  %v4216_v43 = vmax.f32 %v3665_v0, %v3667_v42 }
 0x329   : > { %v4217_v31 = vmov 0.0|0.0  }
 0x32b   : > { %v3841_v28 = vpop.eup %2803 }
 0x32c   : > { %v3843_v62 = vpop.eup %2805 }
 0x32d   : > { %v3845_v56 = vpop.eup %2807  ;;  %v1619_v24 = vadd.f32 %v3843_v62, %v3841_v28 }
 0x32e   : > { %v3849_v55 = vpop.eup %2809 }
 0x32f   : > { %v3851_v21 = vpop.eup %2811  ;;  %1620 = vadd.xlane.f32.xlu0 %v1619_v24  ;;  %v1622_v35 = vadd.f32 %v3849_v55, %v3845_v56 }
 0x330   : > { %v3855_v38 = vpop.eup %2813 }
 0x331   : > { %v3857_v52 = vpop.eup %2815  ;;  %v1625_v3 = vadd.f32 %v3855_v38, %v3851_v21  ;;  %1623 = vadd.xlane.f32.xlu1 %v1622_v35 }
 0x332   : > { %v3861_v23 = vpop.eup %2817 }
 0x333   : > { %1626 = vadd.xlane.f32.xlu0 %v1625_v3  ;;  %v1628_v57 = vadd.f32 %v3861_v23, %v3857_v52 }
 0x335   : > { %1629 = vadd.xlane.f32.xlu1 %v1628_v57 }
 0x337   : > { %1954 = vmax.xlane.f32.xlu0 %v4213_v25 }
 0x339   : > { %1957 = vmax.xlane.f32.xlu1 %v4214_v14  ;;  %v996_v14 = vld [vmem:[%s4144_s2] sm:$0xf] }
 0x33b   : > { %1960 = vmax.xlane.f32.xlu0 %v4215_v45 }
 0x33d   : > { %1963 = vmax.xlane.f32.xlu1 %v4216_v43 }
 0x361   : > { %v973_v51 = vpop.f32.mrb[10].mxu1 }
 0x362   : > { %v975_v13 = vpop.f32.mrb[11].mxu1  ;;  %v992_v34 = vmul.f32 0.00069053395, %v973_v51 }
 0x365   : > { %v978_v33 = vpop.f32.mrb[12].mxu1 }
 0x366   : > { %v993_v1 = vmul.f32 0.00069053395, %v978_v33  ;;  %v980_v60 = vpop.f32.mrb[13].mxu1 }
 0x368   : > { %v2542_v18 = vpack.c.bf16 %v993_v1, %v992_v34 }
 0x369   : > { %v983_v58 = vpop.f32.mrb[14].mxu1 }
 0x36a   : > { %v985_v59 = vpop.f32.mrb[15].mxu1  ;;  %2543 = vmatpush3.bf16.msra.mxu1 %v2542_v18  ;;  %v994_v35 = vmul.f32 0.00069053395, %v983_v58 }
 0x36b   : > { %2544 = vmatprep.subr.bf16.mxu1 %v4217_v31 }
 0x36d   : > { %v988_v24 = vpop.f32.mrb[16].mxu1 }
 0x36e   : > { %v995_v3 = vmul.f32 0.00069053395, %v988_v24  ;;  %v990_v57 = vpop.f32.mrb[17].mxu1 }
 0x370   : > { %v2545_v25 = vpack.c.bf16 %v995_v3, %v994_v35 }
 0x372   : > { %2546 = vmatpush3.bf16.msra.mxu1 %v2545_v25 }
 0x373   : > { %2548 = vmatprep.subr.bf16.mxu1 %v2547_v20 }
 0x375   : > { %2498 = vmatmul.mubr.msk.f32.vlgmr.msra.gmra.mrb[18].mxu1 %vm997_vm3, %v996_v14 }
 0x376   : > { %1265 = vmatprep.mubr.f32.mxu1 %v3799_v22 }
 0x37b   : > { %2550 = vmatpush1.bf16.xpose.msra.mxu1 %v2549_v26 }
 0x37c   : > { %2552 = vmatprep.subr.bf16.mxu1 %v2551_v10 }
 0x383   : > { %2554 = vmatpush1.bf16.xpose.msra.mxu1 %v2553_v47 }
 0x384   : > { %2555 = vmatprep.subr.bf16.mxu1 %v4217_v31 }
 0x38a   : > { %1266 = vmatmul.mubr.f32.vlgmr.msra.gmra.mrb[20].mxu1 %v3797_v49 }
 0x38b   : > { %1270 = vmatprep.mubr.f32.mxu1 %v3803_v11 }
 0x38e   : > { %1271 = vmatmul.mubr.f32.gmra.mrb[22].mxu1 %v3801_v37 }
 0x38f   : > { %1275 = vmatprep.mubr.f32.mxu1 %v3807_v30 }
 0x392   : > { %1276 = vmatmul.mubr.f32.gmra.mrb[24].mxu1 %v3805_v61 }
 0x393   : > { %1280 = vmatprep.mubr.f32.mxu1 %v3811_v4 }
 0x396   : > { %1281 = vmatmul.mubr.f32.gmra.mrb[26].mxu1 %v3809_v15 }
 0x397   : > { %2508 = vmatprep.mubr.msk.f32.mxu1 %vm2922_vm2, %v4206_v53 }
 0x3bc   : > { %v1621_v22 = vpop.xlane.xlu0 %1620 }
 0x3bd   : > { %2819 = vrcp.f32 %v1621_v22 }
 0x3be   : > { %v1624_v20 = vpop.xlane.xlu1 %1623 }
 0x3bf   : > { %2821 = vrcp.f32 %v1624_v20 }
 0x3c0   : > { %v1627_v49 = vpop.xlane.xlu0 %1626 }
 0x3c1   : > { %2823 = vrcp.f32 %v1627_v49 }
 0x3c2   : > { %v1630_v11 = vpop.xlane.xlu1 %1629 }
 0x3c3   : > { %2825 = vrcp.f32 %v1630_v11 }
 0x3c4   : > { %v1955_v37 = vpop.xlane.xlu0 %1954 }
 0x3c5   : > { %v1965_v30 = vsub.f32 %v3638_v8, %v1955_v37  ;;  %v1966_v61 = vsub.f32 %v3643_v29, %v1955_v37 }
 0x3c6   : > { %v1958_v26 = vpop.xlane.xlu1 %1957 }
 0x3c7   : > { %v2820_v4 = vpop.eup %2819  ;;  %v1973_v10 = vmul.f32 1.442695, %v1965_v30  ;;  %v1975_v15 = vmul.f32 1.442695, %v1966_v61  ;;  %v1967_v47 = vsub.f32 %v3646_v2, %v1958_v26  ;;  %v1968_v45 = vsub.f32 %v3652_v6, %v1958_v26  ;;  %v264_v26 = vld [vmem:[%s4143_s1 + $0x140] sm:$0xff] }
 0x3c8   : > { %v1961_v43 = vpop.xlane.xlu0 %1960  ;;  %v3898_v51 = vmul.f32 %v2820_v4, %v3843_v62  ;;  %v3901_v13 = vmul.f32 %v2820_v4, %v3841_v28  ;;  %2443 = vmatmul.mubr.msk.f32.gmra.mrb[80].mxu0 %vm274_vm1, %v264_v26  ;;  %v265_v4 = vld [vmem:[%s4143_s1 + $0x148] sm:$0xff]  ;;  %v4219_v26 = vpack.c.bf16 %v3453_v39, %v3450_v63 }
 0x3c9   : > { %v2822_v33 = vpop.eup %2821  ;;  %2827 = vpow2.f32 %v1973_v10  ;;  %v1977_v8 = vmul.f32 1.442695, %v1967_v47  ;;  %v1979_v34 = vmul.f32 1.442695, %v1968_v45  ;;  %v1969_v29 = vsub.f32 %v3656_v9, %v1961_v43  ;;  %734 = vmatprep.mubr.f32.mxu0 %v4206_v53  ;;  %v266_v10 = vld [vmem:[%s4143_s1 + $0x150] sm:$0xff]  ;;  %v4222_v63 = vld [vmem:[#allocation8_spill] sm:$0xff] }
 0x3ca   : > { %2829 = vpow2.f32 %v1975_v15  ;;  %v1970_v1 = vsub.f32 %v3659_v44, %v1961_v43  ;;  %v1964_v60 = vpop.xlane.xlu1 %1963  ;;  %v3906_v2 = vmul.f32 %v2822_v33, %v3849_v55  ;;  %v3909_v6 = vmul.f32 %v2822_v33, %v3845_v56 }
 0x3cb   : > { %v2824_v62 = vpop.eup %2823  ;;  %2831 = vpow2.f32 %v1977_v8  ;;  %v1981_v28 = vmul.f32 1.442695, %v1969_v29  ;;  %v1971_v18 = vsub.f32 %v3665_v0, %v1964_v60  ;;  %v1972_v58 = vsub.f32 %v3667_v42, %v1964_v60 }
 0x3cc   : > { %2833 = vpow2.f32 %v1979_v34  ;;  %v1983_v59 = vmul.f32 1.442695, %v1970_v1  ;;  %v2577_v9 = vpack.c.bf16 %v3906_v2, %v3898_v51  ;;  %v2579_v44 = vpack.c.bf16 %v3909_v6, %v3901_v13  ;;  %2444 = vmatmul.mubr.msk.f32.gmra.mrb[82].mxu0 %vm274_vm1, %v265_v4 }
 0x3cd   : > { %v2826_v55 = vpop.eup %2825  ;;  %2835 = vpow2.f32 %v1981_v28  ;;  %v1985_v24 = vmul.f32 1.442695, %v1971_v18  ;;  %v1987_v56 = vmul.f32 1.442695, %v1972_v58  ;;  %v3918_v35 = vmul.f32 %v2824_v62, %v3855_v38  ;;  %740 = vmatprep.mubr.f32.mxu0 %v4206_v53 }
 0x3ce   : > { %2837 = vpow2.f32 %v1983_v59  ;;  %v3921_v0 = vmul.f32 %v2826_v55, %v3861_v23  ;;  %v3924_v42 = vmul.f32 %v2824_v62, %v3851_v21  ;;  %v3927_v3 = vmul.f32 %v2826_v55, %v3857_v52 }
 0x3cf   : > { %2839 = vpow2.f32 %v1985_v24  ;;  %v4223_v39 = vpack.c.bf16 %v3395_v5, %v4222_v63 }
 0x3d0   : > { %2841 = vpow2.f32 %v1987_v56  ;;  %v2581_v57 = vpack.c.bf16 %v3921_v0, %v3918_v35  ;;  %v2583_v25 = vpack.c.bf16 %v3927_v3, %v3924_v42  ;;  %2445 = vmatmul.mubr.msk.f32.gmra.mrb[84].mxu0 %vm274_vm1, %v266_v10 }
 0x3d3   : > { %v2828_v38 = vpop.eup %2827 }
 0x3d4   : > { %v3933_v14 = vpop.eup %2829 }
 0x3d5   : > { %v2832_v22 = vpop.eup %2831  ;;  %v1989_v23 = vadd.f32 %v3933_v14, %v2828_v38 }
 0x3d6   : > { %v3936_v20 = vpop.eup %2833 }
 0x3d7   : > { %v3938_v21 = vpop.eup %2835  ;;  %1990 = vadd.xlane.f32.xlu0 %v1989_v23  ;;  %v1992_v52 = vadd.f32 %v3936_v20, %v2832_v22  ;;  %v2452_v23 = vld [vmem:[%s4144_s2 + $0x4] sm:$0xf] }
 0x3d8   : > { %v3941_v49 = vpop.eup %2837 }
 0x3d9   : > { %v3943_v11 = vpop.eup %2839  ;;  %v1995_v37 = vadd.f32 %v3941_v49, %v3938_v21  ;;  %1993 = vadd.xlane.f32.xlu1 %v1992_v52 }
 0x3da   : > { %v3947_v30 = vpop.eup %2841 }
 0x3db   : > { %1996 = vadd.xlane.f32.xlu0 %v1995_v37  ;;  %v1998_v61 = vadd.f32 %v3947_v30, %v3943_v11  ;;  %v4218_v37 = vpack.c.bf16 %v3469_v54, %v3466_v17  ;;  %v4221_v54 = vpack.c.bf16 %v3459_v41, %v3456_v40  ;;  %v4227_v40 = vld [vmem:[#allocation10_spill] sm:$0xff]  ;;  %v4228_v41 = vld [vmem:[#allocation9_spill] sm:$0xff] }
 0x3dc   : > { %v4229_v5 = vpack.c.bf16 %v4227_v40, %v4228_v41 }
 0x3dd   : > { %1999 = vadd.xlane.f32.xlu1 %v1998_v61 }
 0x448   : > { %v1067_v15 = vpop.f32.mrb[18].mxu1 }
 0x449   : > { %v2499_v47 = vpop.f32.mrb[19].mxu1 }
 0x44a   : > { %v4220_v47 = vpack.c.bf16 %v3475_v27, %v3472_v50  ;;  %v4224_v27 = vld [vmem:[#allocation7_spill] sm:$0xff] }
 0x45d   : > { %v1267_v45 = vpop.f32.mrb[20].mxu1 }
 0x45e   : > { %v1269_v43 = vpop.f32.mrb[21].mxu1  ;;  %v1286_v8 = vmul.f32 0.00069053395, %v1267_v45 }
 0x461   : > { %v1272_v33 = vpop.f32.mrb[22].mxu1 }
 0x462   : > { %v1287_v34 = vmul.f32 0.00069053395, %v1272_v33  ;;  %v1274_v29 = vpop.f32.mrb[23].mxu1 }
 0x463   : > { %v4225_v29 = vld [vmem:[#allocation6_spill] sm:$0xff] }
 0x464   : > { %v2556_v1 = vpack.c.bf16 %v1287_v34, %v1286_v8  ;;  %v1991_v60 = vpop.xlane.xlu0 %1990 }
 0x465   : > { %2843 = vrcp.f32 %v1991_v60  ;;  %v1277_v62 = vpop.f32.mrb[24].mxu1  ;;  %v4230_v60 = vld [vmem:[#allocation12_spill] sm:$0xff] }
 0x466   : > { %v1279_v28 = vpop.f32.mrb[25].mxu1  ;;  %2557 = vmatpush3.bf16.msra.mxu1 %v2556_v1  ;;  %v1994_v18 = vpop.xlane.xlu1 %1993  ;;  %v1288_v59 = vmul.f32 0.00069053395, %v1277_v62  ;;  %v4226_v1 = vpack.c.bf16 %v4224_v27, %v4225_v29  ;;  %v4231_v62 = vld [vmem:[#allocation11_spill] sm:$0xff] }
 0x467   : > { %2845 = vrcp.f32 %v1994_v18  ;;  %2558 = vmatprep.subr.bf16.mxu1 %v4217_v31  ;;  %v4232_v28 = vpack.c.bf16 %v4230_v60, %v4231_v62  ;;  %v4233_v18 = vld [vmem:[#allocation18_spill] sm:$0xff]  ;;  %v4248_v62 = vld [vmem:[#allocation25_spill] sm:$0xff] }
 0x468   : > { %v4247_v60 = vld [vmem:[#allocation26_spill] sm:$0xff] }
 0x469   : > { %v1282_v58 = vpop.f32.mrb[26].mxu1 }
 0x46a   : > { %v1289_v55 = vmul.f32 0.00069053395, %v1282_v58  ;;  %v1284_v24 = vpop.f32.mrb[27].mxu1  ;;  %v4234_v58 = vld [vmem:[#allocation17_spill] sm:$0xff] }
 0x46b   : > { %v4236_v24 = vld [vmem:[#allocation14_spill] sm:$0xff] }
 0x46c   : > { %v2559_v56 = vpack.c.bf16 %v1289_v55, %v1288_v59  ;;  %v4235_v59 = vpack.c.bf16 %v4233_v18, %v4234_v58 }
 0x46e   : > { %2560 = vmatpush3.bf16.msra.mxu1 %v2559_v56  ;;  %v4237_v56 = vld [vmem:[#allocation13_spill] sm:$0xff] }
 0x46f   : > { %v3969_v52 = vpop.eup %2843  ;;  %2562 = vmatprep.subr.bf16.mxu1 %v4218_v37  ;;  %v4239_v37 = vld [vmem:[#allocation20_spill] sm:$0xff] }
 0x470   : > { %v3980_v4 = vmul.f32 %v3969_v52, %v2828_v38 }
 0x471   : > { %v2846_v61 = vpop.eup %2845  ;;  %2509 = vmatmul.mubr.msk.f32.vlgmr.msra.gmra.mrb[28].mxu1 %vm997_vm3, %v2452_v23  ;;  %v4238_v23 = vpack.c.bf16 %v4236_v24, %v4237_v56 }
 0x472   : > { %2564 = vmatpush1.bf16.msra.mxu1 %v4219_v26  ;;  %1432 = vmatprep.mubr.f32.mxu1 %v4206_v53  ;;  %v3982_v10 = vmul.f32 %v2846_v61, %v2832_v22  ;;  %v2008_v55 = vmul.f32 %v2846_v61, %v3936_v20  ;;  %v4240_v26 = vld [vmem:[#allocation19_spill] sm:$0xff]  ;;  %v2000_v20 = vpop.xlane.xlu1 %1999  ;;  %v1997_v61 = vpop.xlane.xlu0 %1996 }
 0x473   : > { %2566 = vmatprep.subr.bf16.mxu1 %v4220_v47  ;;  %v4241_v47 = vpack.c.bf16 %v4239_v37, %v4240_v26  ;;  %2847 = vrcp.f32 %v2000_v20 }
 0x474   : > { %v2601_v17 = vpack.c.bf16 %v3982_v10, %v3980_v4  ;;  %2849 = vrcp.f32 %v1997_v61 }
 0x476   : > { %2568 = vmatpush1.bf16.msra.mxu1 %v4221_v54  ;;  %v2006_v54 = vmul.f32 %v3969_v52, %v3933_v14 }
 0x477   : > { %2570 = vmatprep.subr.bf16.mxu1 %v4223_v39  ;;  %v4242_v39 = vld [vmem:[#allocation16_spill] sm:$0xff] }
 0x478   : > { %v2599_v63 = vpack.c.bf16 %v2008_v55, %v2006_v54 }
 0x49b   : > { %v730_v45 = vpop.f32.mrb[80].mxu0 }
 0x49c   : > { %v732_v38 = vpop.f32.mrb[81].mxu0 }
 0x49f   : > { %v736_v43 = vpop.f32.mrb[82].mxu0 }
 0x4a0   : > { %v738_v22 = vpop.f32.mrb[83].mxu0 }
 0x4a3   : > { %v742_v33 = vpop.f32.mrb[84].mxu0 }
 0x4a4   : > { %v744_v8 = vpop.f32.mrb[85].mxu0 }
 0x544   : > { %v1361_v34 = vpop.f32.mrb[28].mxu1 }
 0x545   : > { %v2510_v50 = vpop.f32.mrb[29].mxu1  ;;  %2454 = vmatmul.mubr.msk.f32.vlgmr.msra.gmra.mrb[30].mxu1 %vm997_vm3, %v1361_v34 }
 0x546   : > { %2572 = vmatpush1.bf16.msra.mxu1 %v4226_v1  ;;  %1506 = vmatprep.mubr.f32.mxu1 %v4206_v53 }
 0x547   : > { %2574 = vmatprep.subr.bf16.mxu1 %v4229_v5  ;;  %v2459_v5 = vld [vmem:[%s4144_s2 + $0xc] sm:$0xf] }
 0x54a   : > { %2576 = vmatpush1.bf16.msra.mxu1 %v4232_v28  ;;  %v4249_v28 = vpack.c.bf16 %v4247_v60, %v4248_v62 }
 0x54b   : > { %2578 = vmatprep.subr.bf16.mxu1 %v2577_v9 }
 0x54d   : > { %2455 = vmatmul.mubr.msk.f32.vlgmr.msra.gmra.mrb[30].mxu1 %vm997_vm3, %v1067_v15  ;;  %v2456_v15 = vld [vmem:[%s4144_s2 + $0x8] sm:$0xf] }
 0x54e   : > { %1707 = vmatprep.mubr.f32.mxu1 %v732_v38 }
 0x553   : > { %2580 = vmatpush1.bf16.xpose.msra.mxu1 %v2579_v44 }
 0x554   : > { %2582 = vmatprep.subr.bf16.mxu1 %v2581_v57 }
 0x55b   : > { %2584 = vmatpush1.bf16.xpose.msra.mxu1 %v2583_v25 }
 0x55c   : > { %2585 = vmatprep.subr.bf16.mxu1 %v4217_v31 }
 0x562   : > { %1708 = vmatmul.mubr.f32.vlgmr.msra.gmra.mrb[32].mxu1 %v730_v45  ;;  %v4243_v45 = vld [vmem:[#allocation15_spill] sm:$0xff] }
 0x563   : > { %1712 = vmatprep.mubr.f32.mxu1 %v738_v22  ;;  %v4244_v38 = vpack.c.bf16 %v4242_v39, %v4243_v45 }
 0x566   : > { %1713 = vmatmul.mubr.f32.gmra.mrb[34].mxu1 %v736_v43  ;;  %v2848_v43 = vpop.eup %2847 }
 0x567   : > { %1717 = vmatprep.mubr.f32.mxu1 %v744_v8  ;;  %v2850_v22 = vpop.eup %2849  ;;  %v2011_v52 = vmul.f32 %v2848_v43, %v3943_v11 }
 0x568   : > { %v2010_v8 = vmul.f32 %v2850_v22, %v3941_v49  ;;  %v2009_v27 = vmul.f32 %v2850_v22, %v3938_v21  ;;  %v4246_v49 = vld [vmem:[#allocation29_spill] sm:$0xff] }
 0x56a   : > { %1718 = vmatmul.mubr.f32.gmra.mrb[36].mxu1 %v742_v33  ;;  %v2012_v33 = vmul.f32 %v2848_v43, %v3947_v30  ;;  %v2605_v29 = vpack.c.bf16 %v2011_v52, %v2009_v27 }
 0x56b   : > { %1722 = vmatprep.mubr.f32.mxu1 %v3776_v46 }
 0x56c   : > { %v2603_v14 = vpack.c.bf16 %v2012_v33, %v2010_v8 }
 0x56e   : > { %1723 = vmatmul.mubr.f32.gmra.mrb[38].mxu1 %v3774_v16 }
 0x56f   : > { %2519 = vmatprep.mubr.msk.f32.mxu1 %vm2922_vm2, %v4206_v53 }
 0x635   : > { %v1709_v51 = vpop.f32.mrb[32].mxu1 }
 0x636   : > { %v1711_v13 = vpop.f32.mrb[33].mxu1  ;;  %v1728_v6 = vmul.f32 0.00069053395, %v1709_v51  ;;  %v4250_v51 = vld [vmem:[#allocation22_spill] sm:$0xff] }
 0x637   : > { %v4251_v13 = vld [vmem:[#allocation21_spill] sm:$0xff] }
 0x639   : > { %v1714_v2 = vpop.f32.mrb[34].mxu1 }
 0x63a   : > { %v1729_v9 = vmul.f32 0.00069053395, %v1714_v2  ;;  %v1716_v44 = vpop.f32.mrb[35].mxu1  ;;  %v4252_v2 = vpack.c.bf16 %v4250_v51, %v4251_v13  ;;  %v2855_v51 = vld [vmem:[%s3010_s9] sm:$0xff]  ;;  %s2856_s9 = scalar_lea.vmem %s4102_s17, 128 }
 0x63b   : > { %v4256_v44 = vld [vmem:[#allocation24_spill] sm:$0xff]  ;;  %p2857_p11 = scmp.ne.s32.totalorder %s4102_s17, %s2856_s9  ;;  %p2864_p1 = scmp.lt.s32.totalorder %s2862_s7, %s2856_s9 }
 0x63c   : > { %v2586_v35 = vpack.c.bf16 %v1729_v9, %v1728_v6  ;;  %v4254_v6 = vld [vmem:[#allocation27_spill] sm:$0xff] }
 0x63d   : > { %v1719_v0 = vpop.f32.mrb[36].mxu1  ;;  %p2858_p12 = pnand %p2857_p11, %p2993_p5  ;;  %p2865_p2 = por %p2864_p1, %p2863_p0 }
 0x63e   : > { %v1721_v42 = vpop.f32.mrb[37].mxu1  ;;  %2587 = vmatpush3.bf16.msra.mxu1 %v2586_v35  ;;  %v1730_v57 = vmul.f32 0.00069053395, %v1719_v0  ;;  %v4257_v35 = vld [vmem:[#allocation23_spill] sm:$0xff] }
 0x63f   : > { %2588 = vmatprep.subr.bf16.mxu1 %v4217_v31  ;;  %v4258_v0 = vpack.c.bf16 %v4256_v44, %v4257_v35  ;;  %v2253_v42 = vld [vmem:[%s4145_s3] sm:$0xf]  ;;  %p2859_p13 = pneg %p2858_p12 }
 0x641   : > { %v1724_v3 = vpop.f32.mrb[38].mxu1  ;;  %p2866_p3 = pnand %p2865_p2, %p2859_p13 }
 0x642   : > { %v1731_v46 = vmul.f32 0.00069053395, %v1724_v3  ;;  %v1726_v25 = vpop.f32.mrb[39].mxu1  ;;  %v2304_v3 = vld [vmem:[%s4146_s4] sm:$0xf] }
 0x644   : > { %v2589_v16 = vpack.c.bf16 %v1731_v46, %v1730_v57  ;;  %v2923_v57 = vmov 0  }
 0x645   : > { %2672 = vset.pattern.permute.xlu0 %v2923_v57  ;;  %2673 = vset.pattern.permute.xlu1 %v2923_v57 }
 0x646   : > { %2590 = vmatpush3.bf16.msra.mxu1 %v2589_v16  ;;  %2256 = vperm.xlu0 %2672, %v2253_v42  }
 0x647   : > { %2592 = vmatprep.subr.bf16.mxu1 %v4235_v59  ;;  %2307 = vperm.xlu1 %2673, %v2304_v3  }
 0x649   : > { %2520 = vmatmul.mubr.msk.f32.vlgmr.msra.gmra.mrb[40].mxu1 %vm997_vm3, %v2456_v15 }
 0x64a   : > { %2594 = vmatpush1.bf16.msra.mxu1 %v4238_v23  ;;  %1874 = vmatprep.mubr.f32.mxu1 %v4206_v53 }
 0x64b   : > { %2596 = vmatprep.subr.bf16.mxu1 %v4241_v47 }
 0x64e   : > { %2598 = vmatpush1.bf16.msra.mxu1 %v4244_v38 }
 0x64f   : > { %2600 = vmatprep.subr.bf16.mxu1 %v2599_v63 }
 0x6c5   : > { %v2257_v25 = vpop.permute.xlu0 %2256 }
 0x71c   : > { %v1803_v34 = vpop.f32.mrb[40].mxu1 }
 0x71d   : > { %v2521_v50 = vpop.f32.mrb[41].mxu1  ;;  %2458 = vmatmul.mubr.msk.f32.vlgmr.msra.gmra.mrb[30].mxu1 %vm997_vm3, %v1803_v34 }
 0x71e   : > { %2602 = vmatpush1.bf16.xpose.msra.mxu1 %v2601_v17  ;;  %2077 = vmatprep.mubr.f32.mxu1 %v3780_v32  ;;  %v4245_v32 = vld [vmem:[#allocation30_spill] sm:$0xff] }
 0x71f   : > { %2604 = vmatprep.subr.bf16.mxu1 %v2603_v14 }
 0x726   : > { %2606 = vmatpush1.bf16.xpose.msra.mxu1 %v2605_v29 }
 0x727   : > { %2607 = vmatprep.subr.bf16.mxu1 %v4217_v31 }
 0x72d   : > { %2078 = vmatmul.mubr.f32.vlgmr.msra.gmra.mrb[42].mxu1 %v3778_v7 }
 0x72e   : > { %2082 = vmatprep.mubr.f32.mxu1 %v3784_v48 }
 0x731   : > { %2083 = vmatmul.mubr.f32.gmra.mrb[44].mxu1 %v3782_v19 }
 0x732   : > { %2087 = vmatprep.mubr.f32.mxu1 %v3788_v36 }
 0x735   : > { %2088 = vmatmul.mubr.f32.gmra.mrb[46].mxu1 %v3786_v12 }
 0x736   : > { %2092 = vmatprep.mubr.f32.mxu1 %v4245_v32 }
 0x739   : > { %2093 = vmatmul.mubr.f32.gmra.mrb[48].mxu1 %v4246_v49 }
 0x73a   : > { %2530 = vmatprep.mubr.msk.f32.mxu1 %vm2922_vm2, %v4206_v53 }
 0x800   : > { %v2079_v21 = vpop.f32.mrb[42].mxu1 }
 0x801   : > { %v2081_v11 = vpop.f32.mrb[43].mxu1  ;;  %v2098_v4 = vmul.f32 0.00069053395, %v2079_v21 }
 0x804   : > { %v2084_v30 = vpop.f32.mrb[44].mxu1 }
 0x805   : > { %v2099_v7 = vmul.f32 0.00069053395, %v2084_v30  ;;  %v2086_v10 = vpop.f32.mrb[45].mxu1 }
 0x807   : > { %v2608_v48 = vpack.c.bf16 %v2099_v7, %v2098_v4 }
 0x808   : > { %v2089_v17 = vpop.f32.mrb[46].mxu1 }
 0x809   : > { %v2091_v19 = vpop.f32.mrb[47].mxu1  ;;  %2609 = vmatpush3.bf16.msra.mxu1 %v2608_v48  ;;  %v2100_v36 = vmul.f32 0.00069053395, %v2089_v17 }
 0x80a   : > { %2610 = vmatprep.subr.bf16.mxu1 %v4217_v31  ;;  %v4253_v31 = vld [vmem:[#allocation28_spill] sm:$0xff] }
 0x80b   : > { %v4255_v9 = vpack.c.bf16 %v4253_v31, %v4254_v6 }
 0x80c   : > { %v2094_v12 = vpop.f32.mrb[48].mxu1 }
 0x80d   : > { %v2101_v1 = vmul.f32 0.00069053395, %v2094_v12  ;;  %v2096_v40 = vpop.f32.mrb[49].mxu1 }
 0x80e   : > { %v2308_v40 = vpop.permute.xlu1 %2307 }
 0x80f   : > { %v2611_v41 = vpack.c.bf16 %v2101_v1, %v2100_v36 }
 0x811   : > { %2612 = vmatpush3.bf16.msra.mxu1 %v2611_v41 }
 0x812   : > { %2614 = vmatprep.subr.bf16.mxu1 %v4249_v28 }
 0x814   : > { %2531 = vmatmul.mubr.msk.f32.vlgmr.msra.gmra.mrb[50].mxu1 %vm997_vm3, %v2459_v5 }
 0x815   : > { %2616 = vmatpush1.bf16.msra.mxu1 %v4252_v2  ;;  %2244 = vmatprep.mubr.f32.mxu1 %v4206_v53  ;;  %v4259_v2 = vld [vmem:[#allocation5_spill] sm:$0xff] }
 0x816   : > { %2618 = vmatprep.subr.bf16.mxu1 %v4255_v9 }
 0x819   : > { %2620 = vmatpush1.bf16.msra.mxu1 %v4258_v0 }
 0x8e7   : > { %v2173_v53 = vpop.f32.mrb[50].mxu1 }
 0x8e8   : > { %2461 = vmatmul.mubr.msk.f32.vlgmr.msra.gmra.mrb[30].mxu1 %vm997_vm3, %v2173_v53  ;;  %v2532_v46 = vpop.f32.mrb[51].mxu1 }
 0x9bb   : > { %v2246_v16 = vpop.f32.mrb[30].mxu1 }
 0x9bc   : > { %v2259_v15 = vadd.f32 %v2257_v25, %v2246_v16  ;;  %v2248_v18 = vpop.f32.mrb[31].mxu1 }
 0x9bd   : > { %v2260_v58 = vadd.f32 %v2257_v25, %v2248_v18 }
 0x9be   : > { %v2261_v59 = vsel %vm419_vm0, %v2259_v15, 0.0 }
 0x9bf   : > { %v2262_v55 = vrot.slane %v2261_v59, 4  ;;  %v2268_v24 = vsel %vm419_vm0, %v2260_v58, 0.0 }
 0x9c0   : > { %v2269_v56 = vrot.slane %v2268_v24, 4 }
 0x9c1   : > { %v2263_v23 = vadd.f32 %v2262_v55, %v2261_v59 }
 0x9c2   : > { %v2270_v37 = vadd.f32 %v2269_v56, %v2268_v24 }
 0x9c3   : > { %v2264_v26 = vrot.slane %v2263_v23, 2 }
 0x9c4   : > { %v2271_v47 = vrot.slane %v2270_v37, 2 }
 0x9c5   : > { %v2265_v54 = vadd.f32 %v2264_v26, %v2263_v23 }
 0x9c6   : > { %v2272_v63 = vadd.f32 %v2271_v47, %v2270_v37 }
 0x9c7   : > { %v2266_v39 = vrot.slane %v2265_v54, 1 }
 0x9c8   : > { %v2273_v45 = vrot.slane %v2272_v63, 1 }
 0x9c9   : > { %v2267_v38 = vadd.f32 %v2266_v39, %v2265_v54 }
 0x9ca   : > { %v2274_v20 = vadd.f32 %v2273_v45, %v2272_v63 }
 0x9cb   : > { %v2276_v61 = vmul.f32 0.25, %v2267_v38 }
 0x9cc   : > { %v2277_v43 = vmul.f32 0.25, %v2274_v20 }
 0x9cd   : > { %v2278_v22 = vsub.f32 %v2259_v15, %v2276_v61 }
 0x9ce   : > { %v2279_v33 = vsub.f32 %v2260_v58, %v2277_v43 }
 0x9cf   : > { %v2280_v8 = vmul.f32 %v2278_v22, %v2278_v22 }
 0x9d0   : > { %v2281_v34 = vmul.f32 %v2279_v33, %v2279_v33 }
 0x9d1   : > { %v2282_v50 = vsel %vm419_vm0, %v2280_v8, 0.0 }
 0x9d2   : > { %v2283_v14 = vrot.slane %v2282_v50, 4  ;;  %v2289_v52 = vsel %vm419_vm0, %v2281_v34, 0.0 }
 0x9d3   : > { %v2290_v27 = vrot.slane %v2289_v52, 4 }
 0x9d4   : > { %v2284_v29 = vadd.f32 %v2283_v14, %v2282_v50 }
 0x9d5   : > { %v2291_v32 = vadd.f32 %v2290_v27, %v2289_v52 }
 0x9d6   : > { %v2285_v49 = vrot.slane %v2284_v29, 2 }
 0x9d7   : > { %v2292_v21 = vrot.slane %v2291_v32, 2 }
 0x9d8   : > { %v2286_v11 = vadd.f32 %v2285_v49, %v2284_v29 }
 0x9d9   : > { %v2293_v30 = vadd.f32 %v2292_v21, %v2291_v32 }
 0x9da   : > { %v2287_v4 = vrot.slane %v2286_v11, 1 }
 0x9db   : > { %v2294_v7 = vrot.slane %v2293_v30, 1 }
 0x9dc   : > { %v2288_v10 = vadd.f32 %v2287_v4, %v2286_v11 }
 0x9dd   : > { %v2295_v48 = vadd.f32 %v2294_v7, %v2293_v30 }
 0x9de   : > { %v2296_v17 = vmul.f32 0.25, %v2288_v10 }
 0x9df   : > { %v2297_v19 = vmul.f32 0.25, %v2295_v48 }
 0x9e0   : > { %v2298_v12 = vadd.f32 1e-05, %v2296_v17 }
 0x9e1   : > { %v2299_v36 = vadd.f32 1e-05, %v2297_v19 }
 0x9e2   : > { %2851 = vrsqrt.f32 %v2298_v12 }
 0x9e3   : > { %2853 = vrsqrt.f32 %v2299_v36 }
 0x9ec   : > { %v2852_v1 = vpop.eup %2851 }
 0x9ed   : > { %v2854_v41 = vpop.eup %2853  ;;  %v2302_v5 = vmul.f32 %v2852_v1, %v2278_v22 }
 0x9ee   : > { %v2303_v60 = vmul.f32 %v2854_v41, %v2279_v33 }
 0x9ef   : > { %v2310_v62 = vmul.f32 %v2308_v40, %v2302_v5 }
 0x9f0   : > { %v2311_v28 = vmul.f32 %v2308_v40, %v2303_v60 }
 0x9f1   : > { %v2313_v13 = vadd.f32 %v2855_v51, %v2310_v62 }
 0x9f2   : > { %v2314_v31 = vadd.f32 %v2311_v28, %v4259_v2 }
 0x9f4   : > { %v2317_v6 = vcombine.low %v2313_v13, %v2314_v31 }
 0x9f6   : > { %2319 = vst [vmem:[%s217_s16] sm:$0xff] %v2317_v6 }
 0x9f7   : > { %2869 = shalt.err (!%p2866_p3)
}
 0x9f8   : > { %s2870_s8 = scalar_lea.hbm %s4100_s26, 128  ;;  %s2874_s12 = scalar_lea.hbm %s4147_s5, 256 }
 0x9f9   : > { %p2871_p4 = scmp.ne.s32.totalorder %s4100_s26, %s2870_s8  ;;  %p2875_p9 = scmp.lt.u32.totalorder %s4100_s26, %s4147_s5 }
 0x9fa   : > { %p2876_p10 = scmp.lt.u32.totalorder %s2874_s12, %s2870_s8  ;;  %p2878_p12 = scmp.lt.u32.totalorder %s2870_s8, %s4100_s26 }
 0x9fb   : > { %p2872_p7 = pnand %p2871_p4, %p2993_p5 }
 0x9fc   : > { %p2877_p11 = por %p2876_p10, %p2875_p9 }
 0x9fd   : > { %p2873_p8 = pneg %p2872_p7 }
 0x9fe   : > { %p2879_p13 = por %p2878_p12, %p2877_p11 }
 0xa00   : > { %p2880_p0 = pnand %p2879_p13, %p2873_p8 }
 0xa02   : > { %2883 = shalt.err (!%p2880_p0)
}
 0xa03   : > { %2629 = dma.vmem_to_hbm [thread:$0]  (%p2993_p5), %s4102_s17, 128, %s4100_s26, %s2321_s30  }
 0xa04 PF: > { %p2635_p1 = scmp.ge.s32.totalorder %s2918_s21, 2  ;;  %s2347_s15 = sand.u32 1, %s2906_s18  }
 0xa05   : > { %s2348_s16 = scalar_lea.sflag [#allocation3], %s2347_s15 }
 0xa06   : > { %p2632_p2 = pnand %p2635_p1, %p2997_p6 }
 0xa08   : > { %2901 = dma.done.wait (!%p2632_p2), %s2348_s16, 128  }
 0xa09   : > { %2903 = vsyncadd (!%p2632_p2), %s2348_s16, 4294967168  ;;  %p15_p3 = scmp.ge.s32.totalorder %s2980_s24, 4   ;;  %s4260_s18 = smov %s2910_s19 }
 0xa0a   : > { %s4261_s19 = smov %s2914_s20  ;;  %s4262_s20 = smov %s2991_s27 }
 0xa0b   : > { %s4263_s21 = smov %s2980_s24  ;;  %17 = sbr.rel (!%p15_p3) target bundleno = 3 (0x3), region = 78 }
 0xa12   :  { %2353 = vsyncpa [#allocation3], 1 }
 0xa13   :  { %2355 = vsyncpa [#allocation3 + $0x1], 1 }

</bundles_post_ra>
